<compile_context>
chip_gen: v5e
topology: v5e:2x2
jax: 0.10.0
libtpu: 0.0.40
codegen_flags: <defaults>
</compile_context>

<pallas_src>
import functools

import jax
import jax.numpy as jnp
from jax.experimental import pallas as pl
from jax.experimental.pallas import tpu as pltpu

F_DIM = 32      # f_dim constructor arg (kept small for the example)
C_FEAT = 4320   # PNASNet-5-Large feature channels (fixed by Linear(4320, f_dim))
POOL = 7        # AvgPool2d(kernel_size=7, stride=1, padding=0) on a 7x7 map == global mean
LANE = 128


def _round_up(n, m):
    return (n + m - 1) // m * m


def _head_kernel(x_ref, w_ref, b_ref, o_ref, acc_ref, *, inv_hw, normalize):
    """One (batch-tile, C-tile) grid step.

    x_ref:   [TB, TC, HW]  feature-map chunk (native NCHW layout, HW on lanes, bf16/f32)
    w_ref:   [TC, FP]      bf16 weight chunk (FP = f_dim lane-padded to 128, zero padded)
    b_ref:   [1, FP]       f32 bias (zero padded)
    o_ref:   [TB, 1, FP]   f32 output slab
    acc_ref: [TB, FP]      f32 accumulator scratch (resident across the C-tile axis)
    """
    k = pl.program_id(1)

    @pl.when(k == 0)
    def _init():
        acc_ref[...] = jnp.zeros_like(acc_ref)

    # AvgPool2d(7, stride=1, pad=0) on a 7x7 map == global spatial mean. f32-accumulating
    # lane reduce over the block in its native dtype (no explicit f32 copy of the block);
    # the 1/HW scale is applied to the small pooled tensor only.
    pooled = jnp.sum(x_ref[...], axis=-1, dtype=jnp.float32) * inv_hw      # [TB, TC] f32

    # Partial Linear(4320, f_dim): bf16 MXU matmul chunk with f32 accumulation.
    acc_ref[...] += jnp.dot(pooled.astype(w_ref.dtype), w_ref[...],
                            preferred_element_type=jnp.float32)

    @pl.when(k == pl.num_programs(1) - 1)
    def _finalize():
        feat = acc_ref[...] + b_ref[...]                                   # [TB, FP] f32
        if normalize:
            # F.normalize(p=2, dim=1) == x * rsqrt(max(sum(x^2), eps^2)). Padded output
            # lanes are exactly zero (zero-padded weights & bias) so they do not perturb
            # the norm; rsqrt keeps the epilogue on the EUP slot. Padded *batch* rows
            # (B % TB != 0) normalize garbage, but their stores are masked -> harmless.
            sumsq = jnp.sum(feat * feat, axis=-1, keepdims=True)
            feat = feat * jax.lax.rsqrt(jnp.maximum(sumsq, 1e-24))
        o_ref[...] = feat[:, None, :].astype(o_ref.dtype)


def _pick_batch_tile(batch, cap):
    # Ensure >=2 grid steps along the (parallel) batch axis whenever B > 1 so both v7x
    # TensorCores get work; `cap` keeps the lane-padded block footprint VMEM-safe
    # (cap=8 is safe on v5e/v6e/v7x; <=16 still fits v7x's 64 MiB, <=32 fits v5e/v6e).
    if batch <= 1:
        return 1
    return max(1, min(cap, pl.cdiv(batch, 2)))


def pnasnet5_head(feat_nchw, w, b, *, normalize=False, batch_tile_cap=8, c_tile=1080):
    """Fused AvgPool2d(7) -> Linear(4320, f_dim) -> optional L2 normalize.

    feat_nchw: [B, 4320, 7, 7] backbone output (NCHW, bf16 or f32 — consumed as-is, no
               wrapper-side cast / extra HBM pass).
    w: [4320, f_dim], b: [f_dim]. Returns [B, f_dim] float32.
    """
    B, C, H, W = feat_nchw.shape
    HW = H * W
    # Hard requirement: AvgPool2d(7, stride=1) is only a global mean on a 7x7 map.
    assert (H, W) == (POOL, POOL), "fusion requires the backbone's 7x7 feature map"
    assert C == w.shape[0]
    assert C % c_tile == 0 and c_tile % 8 == 0
    f_dim = w.shape[1]
    fp = _round_up(max(f_dim, LANE), LANE)          # lane-pad f_dim (32 -> 128)

    # Free reshape (no NCHW transpose): pool over the trailing HW axis in-kernel so the
    # feature map is read from HBM exactly once, in its native dtype.
    x = feat_nchw.reshape(B, C, HW)

    # Zero-padded bf16 weights / f32 bias (zero pad keeps bias + norm semantics exact).
    w_p = jnp.zeros((C, fp), jnp.bfloat16).at[:, :f_dim].set(w.astype(jnp.bfloat16))
    b_p = jnp.zeros((1, fp), jnp.float32).at[:, :f_dim].set(b.astype(jnp.float32))

    tb = _pick_batch_tile(B, batch_tile_cap)
    n_ct = C // c_tile
    grid = (pl.cdiv(B, tb), n_ct)   # batch (parallel) first, C reduction (arbitrary) last

    # VMEM budget from lane-padded block footprints (HW=49 pads to 128 lanes in VMEM):
    hw_pad = _round_up(HW, LANE)
    x_blk = tb * c_tile * hw_pad * x.dtype.itemsize
    w_blk = c_tile * fp * w_p.dtype.itemsize
    vmem_limit = int(2 * x_blk                        # double-buffered feature-map blocks
                     + tb * c_tile * hw_pad * 4       # f32 reduce temp (conservative)
                     + 2 * w_blk                      # double-buffered weight blocks
                     + 2 * (fp * 4 + tb * fp * 4)     # bias + output buffers
                     + tb * fp * 4                    # accumulator scratch
                     + (4 << 20))                     # slack for small temps / internals

    kernel = functools.partial(_head_kernel, inv_hw=1.0 / HW, normalize=normalize)

    out = pl.pallas_call(
        kernel,
        out_shape=jax.ShapeDtypeStruct((B, 1, fp), jnp.float32),
        grid=grid,
        in_specs=[
            pl.BlockSpec((tb, c_tile, HW), lambda i, k: (i, k, 0)),   # feature-map chunk
            pl.BlockSpec((c_tile, fp), lambda i, k: (k, 0)),          # weight chunk
            pl.BlockSpec((1, fp), lambda i, k: (0, 0)),               # bias (tiny, resident)
        ],
        out_specs=pl.BlockSpec((tb, 1, fp), lambda i, k: (i, 0, 0)),
        scratch_shapes=[pltpu.VMEM((tb, fp), jnp.float32)],
        compiler_params=pltpu.CompilerParams(
            dimension_semantics=("parallel", "arbitrary"),  # megacore batch split on v7x
            vmem_limit_bytes=vmem_limit,
        ),
        cost_estimate=pl.CostEstimate(
            flops=2 * B * C * fp + B * C * HW,
            transcendentals=0,
            bytes_accessed=(B * C * HW * x.dtype.itemsize   # feature map (dominant)
                            + C * fp * w_p.dtype.itemsize   # weights (bf16)
                            + fp * 4 + B * fp * 4),         # bias + output (f32)
        ),
    )(x, w_p, b_p)

    return out[:, 0, :f_dim]


if __name__ == "__main__":
    key = jax.random.PRNGKey(0)
    k_feat, k_w, k_b = jax.random.split(key, 3)

    B = 2
    # Backbone feature-map stand-in (what model.features(x) would produce), already bf16 —
    # the kernel reads it directly, no wrapper-side cast.
    feat = jax.random.normal(
        k_feat, (B, C_FEAT, POOL, POOL), dtype=jnp.float32).astype(jnp.bfloat16)

    # Deterministic Linear(4320, f_dim) init (PyTorch default U(-1/sqrt(fan_in), 1/sqrt(fan_in))).
    bound = 1.0 / (C_FEAT ** 0.5)
    w = jax.random.uniform(
        k_w, (C_FEAT, F_DIM), minval=-bound, maxval=bound,
        dtype=jnp.float32).astype(jnp.bfloat16)
    b = jax.random.uniform(k_b, (F_DIM,), minval=-bound, maxval=bound, dtype=jnp.float32)

    # norm=False path (module default)
    out = jax.block_until_ready(pnasnet5_head(feat, w, b, normalize=False))

    # plain-JAX f32 reference computed from the same bf16-quantized inputs
    xf = feat.astype(jnp.float32)
    wf = w.astype(jnp.float32)
    pooled_ref = jnp.mean(xf.reshape(B, C_FEAT, POOL * POOL), axis=-1)
    ref = pooled_ref @ wf + b
    assert out.shape == (B, F_DIM)
    assert jnp.allclose(out, ref, atol=2e-3, rtol=2e-3), "norm=False mismatch"

    # norm=True path (kwargs.get('norm') == True)
    out_n = jax.block_until_ready(pnasnet5_head(feat, w, b, normalize=True))
    ref_n = ref / jnp.maximum(jnp.linalg.norm(ref, axis=1, keepdims=True), 1e-12)
    assert jnp.allclose(out_n, ref_n, atol=2e-3, rtol=2e-3), "norm=True mismatch"

    print("KERNEL_OK")
</pallas_src>

<mosaic_0001>
module attributes {stable_mosaic.version = 11 : i64} {
  func.func @_head_kernel(%arg0: i32, %arg1: i32, %arg2: memref<1x1080x49xbf16, #tpu.memory_space<vmem>>, %arg3: memref<1080x128xbf16, #tpu.memory_space<vmem>>, %arg4: memref<1x128xf32, #tpu.memory_space<vmem>>, %arg5: memref<1x1x128xf32, #tpu.memory_space<vmem>>, %arg6: memref<1x128xf32, #tpu.memory_space<vmem>>) attributes {dimension_semantics = [#tpu.dimension_semantics<parallel>, #tpu.dimension_semantics<arbitrary>], iteration_bounds = array<i64: 2, 4>, scalar_prefetch = 0 : i64, scratch_operands = 1 : i64, tpu.core_type = #tpu.core_type<tc>, window_params = [{transform_indices = @transform_0, window_bounds = array<i64: 1, 1080, 49>}, {transform_indices = @transform_1, window_bounds = array<i64: 1080, 128>}, {pipeline_mode = #tpu.pipeline_mode<synchronous>, transform_indices = @transform_2, window_bounds = array<i64: 1, 128>}, {transform_indices = @transform_3, window_bounds = array<i64: 1, 1, 128>}]} {
    %c0_i32 = arith.constant 0 : i32
    %0 = arith.cmpi eq, %arg1, %c0_i32 : i32
    %1 = arith.extui %0 : i1 to i32
    %c0_i32_0 = arith.constant 0 : i32
    %2 = arith.cmpi ne, %1, %c0_i32_0 : i32
    scf.if %2 {
      %cst_12 = arith.constant 0.000000e+00 : f32
      %17 = vector.broadcast %cst_12 : f32 to vector<1x128xf32>
      %c0_13 = arith.constant 0 : index
      %c0_14 = arith.constant 0 : index
      %18 = vector.load %arg6[%c0_13, %c0_14] : memref<1x128xf32, #tpu.memory_space<vmem>>, vector<1x128xf32>
      tpu.vector_store %arg6[%c0_13, %c0_14], %17 {strides = array<i32>} : memref<1x128xf32, #tpu.memory_space<vmem>>, vector<1x128xf32>,
    } else {
    }
    %c0 = arith.constant 0 : index
    %c0_1 = arith.constant 0 : index
    %c0_2 = arith.constant 0 : index
    %3 = vector.load %arg2[%c0, %c0_1, %c0_2] : memref<1x1080x49xbf16, #tpu.memory_space<vmem>>, vector<1x1080x49xbf16>
    %4 = arith.extf %3 : vector<1x1080x49xbf16> to vector<1x1080x49xf32>
    %cst = arith.constant dense<0.000000e+00> : vector<1x1080xf32>
    %5 = vector.multi_reduction <add>, %4, %cst [2] : vector<1x1080x49xf32> to vector<1x1080xf32>
    %cst_3 = arith.constant 0.0204081628 : f32
    %6 = vector.broadcast %cst_3 : f32 to vector<1x1080xf32>
    %7 = arith.mulf %5, %6 : vector<1x1080xf32>
    %c0_4 = arith.constant 0 : index
    %c0_5 = arith.constant 0 : index
    %8 = vector.load %arg6[%c0_4, %c0_5] : memref<1x128xf32, #tpu.memory_space<vmem>>, vector<1x128xf32>
    %9 = arith.truncf %7 : vector<1x1080xf32> to vector<1x1080xbf16>
    %c0_6 = arith.constant 0 : index
    %c0_7 = arith.constant 0 : index
    %10 = vector.load %arg3[%c0_6, %c0_7] : memref<1080x128xbf16, #tpu.memory_space<vmem>>, vector<1080x128xbf16>
    %cst_8 = arith.constant dense<0.000000e+00> : vector<1x128xf32>
    %11 = tpu.matmul %9, %10, %cst_8 {dimension_numbers = #tpu.dot_dimension_numbers<[1], [0], [0], [1], [0, 0, 1, 1], [], []>} : vector<1x1080xbf16>, vector<1080x128xbf16>, vector<1x128xf32> -> vector<1x128xf32>
    %12 = arith.addf %8, %11 : vector<1x128xf32>
    %c0_9 = arith.constant 0 : index
    %c0_10 = arith.constant 0 : index
    %13 = vector.load %arg6[%c0_9, %c0_10] : memref<1x128xf32, #tpu.memory_space<vmem>>, vector<1x128xf32>
    tpu.vector_store %arg6[%c0_9, %c0_10], %12 {strides = array<i32>} : memref<1x128xf32, #tpu.memory_space<vmem>>, vector<1x128xf32>,
    %c3_i32 = arith.constant 3 : i32
    %14 = arith.cmpi eq, %arg1, %c3_i32 : i32
    %15 = arith.extui %14 : i1 to i32
    %c0_i32_11 = arith.constant 0 : i32
    %16 = arith.cmpi ne, %15, %c0_i32_11 : i32
    scf.if %16 {
      %c0_12 = arith.constant 0 : index
      %c0_13 = arith.constant 0 : index
      %17 = vector.load %arg6[%c0_12, %c0_13] : memref<1x128xf32, #tpu.memory_space<vmem>>, vector<1x128xf32>
      %c0_14 = arith.constant 0 : index
      %c0_15 = arith.constant 0 : index
      %18 = vector.load %arg4[%c0_14, %c0_15] : memref<1x128xf32, #tpu.memory_space<vmem>>, vector<1x128xf32>
      %19 = arith.addf %17, %18 : vector<1x128xf32>
      %20 = vector.shape_cast %19 : vector<1x128xf32> to vector<1x1x128xf32>
      %c0_16 = arith.constant 0 : index
      %c0_17 = arith.constant 0 : index
      %c0_18 = arith.constant 0 : index
      %21 = vector.load %arg5[%c0_16, %c0_17, %c0_18] : memref<1x1x128xf32, #tpu.memory_space<vmem>>, vector<1x1x128xf32>
      tpu.vector_store %arg5[%c0_16, %c0_17, %c0_18], %20 {strides = array<i32>} : memref<1x1x128xf32, #tpu.memory_space<vmem>>, vector<1x1x128xf32>,
    } else {
    }
    return
  }
  func.func @transform_0(%arg0: i32, %arg1: i32) -> (i32, i32, i32) {
    %c0_i32 = arith.constant 0 : i32
    %c0_i32_0 = arith.constant 0 : i32
    return %arg0, %arg1, %c0_i32 : i32, i32, i32
  }
  func.func @transform_1(%arg0: i32, %arg1: i32) -> (i32, i32) {
    %c0_i32 = arith.constant 0 : i32
    %c0_i32_0 = arith.constant 0 : i32
    return %arg1, %c0_i32 : i32, i32
  }
  func.func @transform_2(%arg0: i32, %arg1: i32) -> (i32, i32) {
    %c0_i32 = arith.constant 0 : i32
    %c0_i32_0 = arith.constant 0 : i32
    %c0_i32_1 = arith.constant 0 : i32
    return %c0_i32, %c0_i32_0 : i32, i32
  }
  func.func @transform_3(%arg0: i32, %arg1: i32) -> (i32, i32, i32) {
    %c0_i32 = arith.constant 0 : i32
    %c0_i32_0 = arith.constant 0 : i32
    %c0_i32_1 = arith.constant 0 : i32
    return %arg0, %c0_i32, %c0_i32_0 : i32, i32, i32
  }
}

</mosaic_0001>

<bundles_post_ra>
// kernel: tpu_custom_call.1
= control target key start
LH: loop header
LB: loop body
LE: loop exit
PB: predicated region body
PF: predicated region fallthrough
CT: control target
= control target key end

     0   :  { %8 = vsyncpa [#allocation4], 0  ;;  %s4079_s0 = inlined_call_operand.vmem [shape: bf16[2,4320,49], index: 0, kind: input, shape index: {}]   ;;  %s4080_s1 = inlined_call_operand.vmem [shape: bf16[4320,128], index: 1, kind: input, shape index: {}]   ;;  %s4081_s2 = inlined_call_operand.vmem [shape: f32[1,128], index: 2, kind: input, shape index: {}]   ;;  %s4082_s3 = inlined_call_operand.hbm [shape: f32[2,1,128], index: 3, kind: output, shape index: {}]  }
   0x1   :  { %10 = vsyncpa [#allocation4 + $0x1], 0  ;;  %s3260_s12 = smov 0   ;;  %s3262_s13 = smov 0  }
   0x2   :  { %s3264_s14 = smov 0   ;;  %s3266_s15 = smov 0  }
   0x3   :  { %s3268_s16 = smov 0   ;;  %s3270_s17 = smov 0  }
   0x4   :  { %s3272_s18 = smov 0   ;;  %s3274_s19 = smov 0  }
   0x5 LB: > { %s2389_s20 = sadd.s32 4294967295, %s3237_s19   ;;  %s2390_s21 = sadd.s32 4294967294, %s3237_s19   ;;  %s3237_s19 = sphi %s3274_s19, %s16_s19   ;;  %s3233_s18 = sphi %s3272_s18, %s4091_s18   ;;  %s3229_s17 = sphi %s3270_s17, %s4090_s17   ;;  %s3225_s16 = sphi %s3268_s16, %s4089_s16   ;;  %s3221_s15 = sphi %s3266_s15, %s4088_s15   ;;  %s3217_s14 = sphi %s3264_s14, %s4087_s14   ;;  %s3213_s13 = sphi %s3262_s13, %s4086_s13   ;;  %s3209_s12 = sphi %s3260_s12, %s4085_s12  }
   0x6   : > { %s25_s22 = sadd.s32 1, %s3229_s17  ;;  %s28_s23 = sadd.s32 1, %s3233_s18 }
   0x7   : > { %p26_p0 = scmp.ge.s32.totalorder %s25_s22, 4  ;;  %p120_p1 = scmp.ne.s32.totalorder %s3217_s14, %s3213_s13 }
   0x8   : > { %p121_p2 = scmp.eq.s32.totalorder %s2389_s20, 7  ;;  %p126_p4 = scmp.ne.s32.totalorder %s3213_s13, %s3209_s12 }
   0x9   : > { %s4093_s22 = smov (%p26_p0, %s25_s22), 0  ;;  %s4095_s23 = smov (!%p26_p0, %s28_s23), %s3233_s18 }
   0xa   : > { %p3309_p3 = por %p121_p2, %p120_p1  ;;  %p30_p5 = scmp.ge.s32.totalorder %s4095_s23, 2 }
   0xb   : > { %p127_p6 = scmp.eq.s32.totalorder %s2390_s21, 7  ;;  %p2393_p7 = scmp.ge.s32.totalorder %s3237_s19, 1 }
   0xc   : > { %p170_p8 = scmp.lt.s32.totalorder %s3237_s19, 9  ;;  %s4097_s23 = smov (%p30_p5, %s4095_s23), 0 }
   0xd   : > { %p3319_p9 = por %p127_p6, %p126_p4  ;;  %s107_s26 = ssub.s32 %s3233_s18, %s4097_s23 }
   0xe   : > { %p171_p10 = pnand %p2393_p7, %p170_p8  ;;  %s110_s27 = sadd.s32 1, %s3217_s14 }
   0xf   : > { %p108_p11 = scmp.eq.s32.totalorder %s107_s26, 0  ;;  %s200_s29 = sand.u32 (!%p171_p10), 1, %s3213_s13  }
  0x10   : > { %174 = sbr.rel (%p171_p10) target bundleno = 672 (0x2a0), region = 32  ;;  %p203_p12 = scmp.lt.s32.totalorder (!%p171_p10), %s3225_s16, 1 }
  0x11   : > { %s3327_s28 = scalar_select %p108_p11, %s3217_s14, %s110_s27  }
  0x12   : > { %s202_s30 = smul.u32 (!%p171_p10), 135, %s3221_s15  ;;  %s3345_s27 = scalar_lea.vmem (!%p171_p10), [#allocation3], %s200_s29 }
  0x13   : > { %p2396_p0 = scmp.ne.s32.totalorder (!%p171_p10), %s3221_s15, 0 }
  0x14   : > { %p205_p13 = scmp.lt.s32.totalorder (!%p171_p10), %s202_s30, 539 }
  0x15   : > { %s204_s4 = scalar_select %p203_p12, %s3225_s16, 1 }
  0x16   : > { %s4099_s30 = smov (!%p205_p13, %s202_s30), 539 }
  0x17   : > { %s3070_s5 = smul.u32 540, %s204_s4  ;;  %s2395_s6 = sshll.u32 %s4099_s30, 2 }
  0x18   : > { %s3336_s10 = scalar_lea.vmem %s4080_s1, %s2395_s6  ;;  %222 = sbr.rel (%p2396_p0) target bundleno = 31 (0x1f), region = 36 }
  0x19   : > { %s208_s7 = sadd.s32 %s3070_s5, %s4099_s30 }
  0x1a   : > { %s2394_s11 = sshll.u32 %s208_s7, 2 }
  0x1b   : > { %s3341_s26 = scalar_lea.vmem %s4079_s0, %s2394_s11 }
  0x1d   : > { %v3239_v0 = vmov 0.0  }
  0x1e   : > { %223 = vst [vmem:[#allocation2] sm:$0x1] %v3239_v0 }
  0x1f PF: > { %v3005_v1 = vld [vmem:[%s3341_s26 + $0x10] sm:$0xff]   ;;  %vm494_vm0 = vcmask 400384   ;;  %v3004_v2 = vld [vmem:[%s3341_s26 + $0x8] sm:$0xff]   ;;  %v2737_v3 = vld [vmem:[%s3341_s26] sm:$0xff]   ;;  %vm1447_vm1 = vcmask 130112   ;;  %vm1451_vm2 = vcmask 195712  }
  0x20   : > { %v2746_v4 = vunpack.c.l.bf16 %v3005_v1  ;;  %v2742_v5 = vunpack.c.l.bf16 %v3004_v2  ;;  %v2738_v6 = vunpack.c.l.bf16 %v2737_v3  ;;  %v2747_v10 = vunpack.c.h.bf16 %v3005_v1  ;;  %v3007_v16 = vld [vmem:[%s3341_s26 + $0x20] sm:$0xff]   ;;  %v3006_v17 = vld [vmem:[%s3341_s26 + $0x18] sm:$0xff]   ;;  %v3008_v24 = vld [vmem:[%s3341_s26 + $0x28] sm:$0xff]   ;;  %p2666_p1 = scmp.ne.s32.totalorder %s3221_s15, 3 }
  0x21   : > { %v2743_v11 = vunpack.c.h.bf16 %v3004_v2  ;;  %v2739_v12 = vunpack.c.h.bf16 %v2737_v3  ;;  %v2754_v18 = vunpack.c.l.bf16 %v3007_v16  ;;  %v2751_v19 = vunpack.c.h.bf16 %v3006_v17  ;;  %v3010_v31 = vld [vmem:[%s3341_s26 + $0x38] sm:$0xff]   ;;  %v3009_v32 = vld [vmem:[%s3341_s26 + $0x30] sm:$0xff]   ;;  %v3011_v39 = vld [vmem:[%s3341_s26 + $0x40] sm:$0xff]  }
  0x22   : > { %v507_v7 = vsel %vm494_vm0, %v2746_v4, 0.0  ;;  %v501_v8 = vsel %vm494_vm0, %v2742_v5, 0.0  ;;  %v495_v9 = vsel %vm494_vm0, %v2738_v6, 0.0  ;;  %v510_v13 = vsel %vm494_vm0, %v2747_v10, 0.0  ;;  %v3013_v46 = vld [vmem:[%s3341_s26 + $0x50] sm:$0xff]   ;;  %v3012_v47 = vld [vmem:[%s3341_s26 + $0x48] sm:$0xff]  }
  0x23   : > { %508 = vadd.xlane.f32.xlu2 %v507_v7  ;;  %502 = vadd.xlane.f32.xlu1 %v501_v8  ;;  %v504_v14 = vsel %vm494_vm0, %v2743_v11, 0.0  ;;  %v498_v15 = vsel %vm494_vm0, %v2739_v12, 0.0  ;;  %v2750_v20 = vunpack.c.l.bf16 %v3006_v17  ;;  %v519_v21 = vsel %vm494_vm0, %v2754_v18, 0.0  ;;  %v3014_v54 = vld [vmem:[%s3341_s26 + $0x58] sm:$0xff]   ;;  %v3016_v61 = vld [vmem:[%s3341_s26 + $0x68] sm:$0xff]   ;;  %v3015_v62 = vld [vmem:[%s3341_s26 + $0x60] sm:$0xff]  }
  0x24   : > { %496 = vadd.xlane.f32.xlu0 %v495_v9  ;;  %v516_v22 = vsel %vm494_vm0, %v2751_v19, 0.0  ;;  %v2759_v25 = vunpack.c.h.bf16 %v3008_v24  ;;  %v2758_v26 = vunpack.c.l.bf16 %v3008_v24  ;;  %v2755_v27 = vunpack.c.h.bf16 %v3007_v16  ;;  %v3017_v5 = vld [vmem:[%s3341_s26 + $0x70] sm:$0xff]   ;;  %v3019_v12 = vld [vmem:[%s3341_s26 + $0x80] sm:$0xff]  }
  0x25   : > { %v513_v23 = vsel %vm494_vm0, %v2750_v20, 0.0  ;;  %v2766_v33 = vunpack.c.l.bf16 %v3010_v31  ;;  %v2763_v34 = vunpack.c.h.bf16 %v3009_v32  ;;  %v2762_v35 = vunpack.c.l.bf16 %v3009_v32  ;;  %v3020_v20 = vld [vmem:[%s3341_s26 + $0x88] sm:$0xff]  }
  0x26   : > { %v528_v28 = vsel %vm494_vm0, %v2759_v25, 0.0  ;;  %v525_v29 = vsel %vm494_vm0, %v2758_v26, 0.0  ;;  %v522_v30 = vsel %vm494_vm0, %v2755_v27, 0.0  ;;  %v2771_v40 = vunpack.c.h.bf16 %v3011_v39  ;;  %v3022_v27 = vld [vmem:[%s3341_s26 + $0x98] sm:$0xff]  }
  0x27   : > { %v537_v36 = vsel %vm494_vm0, %v2766_v33, 0.0  ;;  %v534_v37 = vsel %vm494_vm0, %v2763_v34, 0.0  ;;  %v531_v38 = vsel %vm494_vm0, %v2762_v35, 0.0  ;;  %v2770_v41 = vunpack.c.l.bf16 %v3011_v39  ;;  %v3023_v35 = vld [vmem:[%s3341_s26 + $0xa0] sm:$0xff]  }
  0x28   : > { %v2767_v42 = vunpack.c.h.bf16 %v3010_v31  ;;  %v546_v43 = vsel %vm494_vm0, %v2771_v40, 0.0  ;;  %v2778_v48 = vunpack.c.l.bf16 %v3013_v46  ;;  %v2775_v49 = vunpack.c.h.bf16 %v3012_v47 }
  0x29   : > { %v543_v44 = vsel %vm494_vm0, %v2770_v41, 0.0  ;;  %v2774_v50 = vunpack.c.l.bf16 %v3012_v47  ;;  %v2783_v55 = vunpack.c.h.bf16 %v3014_v54  ;;  %v2782_v56 = vunpack.c.l.bf16 %v3014_v54 }
  0x2a   : > { %v540_v45 = vsel %vm494_vm0, %v2767_v42, 0.0  ;;  %v555_v51 = vsel %vm494_vm0, %v2778_v48, 0.0  ;;  %v552_v52 = vsel %vm494_vm0, %v2775_v49, 0.0  ;;  %v2779_v57 = vunpack.c.h.bf16 %v3013_v46  ;;  %v3025_v42 = vld [vmem:[%s3341_s26 + $0xb0] sm:$0xff]  }
  0x2b   : > { %511 = vadd.xlane.f32.xlu2 %v510_v13  ;;  %505 = vadd.xlane.f32.xlu1 %v504_v14  ;;  %v549_v53 = vsel %vm494_vm0, %v2774_v50, 0.0  ;;  %v564_v58 = vsel %vm494_vm0, %v2783_v55, 0.0  ;;  %v561_v59 = vsel %vm494_vm0, %v2782_v56, 0.0  ;;  %v2790_v63 = vunpack.c.l.bf16 %v3016_v61  ;;  %v3018_v13 = vld [vmem:[%s3341_s26 + $0x78] sm:$0xff]   ;;  %v2675_v48 = vld [vmem:[%s3336_s10 + $0x30] sm:$0xff] }
  0x2c   : > { %499 = vadd.xlane.f32.xlu0 %v498_v15  ;;  %v558_v60 = vsel %vm494_vm0, %v2779_v57, 0.0  ;;  %v2787_v0 = vunpack.c.h.bf16 %v3015_v62  ;;  %v2786_v1 = vunpack.c.l.bf16 %v3015_v62  ;;  %v2795_v6 = vunpack.c.h.bf16 %v3017_v5 }
  0x2d   : > { %v573_v2 = vsel %vm494_vm0, %v2790_v63, 0.0  ;;  %v2794_v7 = vunpack.c.l.bf16 %v3017_v5  ;;  %v2791_v8 = vunpack.c.h.bf16 %v3016_v61  ;;  %v2802_v14 = vunpack.c.l.bf16 %v3019_v12  ;;  %v3028_v63 = vld [vmem:[%s3341_s26 + $0xc8] sm:$0xff]  }
  0x2e   : > { %v570_v3 = vsel %vm494_vm0, %v2787_v0, 0.0  ;;  %v567_v4 = vsel %vm494_vm0, %v2786_v1, 0.0  ;;  %v582_v9 = vsel %vm494_vm0, %v2795_v6, 0.0  ;;  %v2799_v15 = vunpack.c.h.bf16 %v3018_v13  ;;  %v3027_v1 = vld [vmem:[%s3341_s26 + $0xc0] sm:$0xff]  }
  0x2f   : > { %v579_v10 = vsel %vm494_vm0, %v2794_v7, 0.0  ;;  %v576_v11 = vsel %vm494_vm0, %v2791_v8, 0.0  ;;  %v2798_v16 = vunpack.c.l.bf16 %v3018_v13  ;;  %v591_v17 = vsel %vm494_vm0, %v2802_v14, 0.0  ;;  %v2671_v14 = vld [vmem:[%s3336_s10 + $0x10] sm:$0xff] }
  0x30   : > { %v588_v18 = vsel %vm494_vm0, %v2799_v15, 0.0  ;;  %v2827_v56 = vunpack.c.h.bf16 %v3025_v42  ;;  %v2835_v5 = vunpack.c.h.bf16 %v3027_v1  ;;  %v2834_v6 = vunpack.c.l.bf16 %v3027_v1 }
  0x31   : > { %v585_v19 = vsel %vm494_vm0, %v2798_v16, 0.0  ;;  %vm1455_vm3 = vcmask 261312   ;;  %vm1459_vm4 = vcmask 326912   ;;  %vm1463_vm5 = vcmask 392512  }
  0x32   : > { %v630_v0 = vsel %vm494_vm0, %v2827_v56, 0.0  ;;  %vm1467_vm6 = vcmask 458112   ;;  %vm1471_vm7 = vcmask 523712   ;;  %vm1475_vm8 = vcmask 589312  }
  0x33   : > { %520 = vadd.xlane.f32.xlu2 %v519_v21  ;;  %517 = vadd.xlane.f32.xlu1 %v516_v22  ;;  %v2807_v21 = vunpack.c.h.bf16 %v3020_v20  ;;  %v2806_v22 = vunpack.c.l.bf16 %v3020_v20  ;;  %v639_v20 = vsel %vm494_vm0, %v2834_v6, 0.0  ;;  %vm1479_vm9 = vcmask 654912  }
  0x34   : > { %514 = vadd.xlane.f32.xlu0 %v513_v23  ;;  %v2803_v23 = vunpack.c.h.bf16 %v3019_v12  ;;  %vm1483_vm10 = vcmask 720512   ;;  %vm1487_vm11 = vcmask 786112   ;;  %vm1491_vm12 = vcmask 851712  }
  0x35   : > { %v600_v24 = vsel %vm494_vm0, %v2807_v21, 0.0  ;;  %v597_v25 = vsel %vm494_vm0, %v2806_v22, 0.0  ;;  %vm1495_vm13 = vcmask 917312   ;;  %vm1499_vm14 = vcmask 982912  }
  0x36   : > { %v594_v26 = vsel %vm494_vm0, %v2803_v23, 0.0  ;;  %vm1503_vm15 = vcmask 1048512  }
  0x3b   : > { %529 = vadd.xlane.f32.xlu2 %v528_v28  ;;  %526 = vadd.xlane.f32.xlu1 %v525_v29  ;;  %v3021_v28 = vld [vmem:[%s3341_s26 + $0x90] sm:$0xff]   ;;  %v2814_v29 = vunpack.c.l.bf16 %v3022_v27 }
  0x3c   : > { %523 = vadd.xlane.f32.xlu0 %v522_v30  ;;  %v2811_v30 = vunpack.c.h.bf16 %v3021_v28  ;;  %v2810_v31 = vunpack.c.l.bf16 %v3021_v28 }
  0x3d   : > { %v609_v32 = vsel %vm494_vm0, %v2814_v29, 0.0 }
  0x3e   : > { %v606_v33 = vsel %vm494_vm0, %v2811_v30, 0.0  ;;  %v603_v34 = vsel %vm494_vm0, %v2810_v31, 0.0 }
  0x43   : > { %538 = vadd.xlane.f32.xlu2 %v537_v36  ;;  %535 = vadd.xlane.f32.xlu1 %v534_v37  ;;  %v2819_v36 = vunpack.c.h.bf16 %v3023_v35  ;;  %v2818_v37 = vunpack.c.l.bf16 %v3023_v35 }
  0x44   : > { %532 = vadd.xlane.f32.xlu0 %v531_v38  ;;  %v2815_v38 = vunpack.c.h.bf16 %v3022_v27  ;;  %v2670_v27 = vld [vmem:[%s3336_s10 + $0x8] sm:$0xff] }
  0x45   : > { %v618_v39 = vsel %vm494_vm0, %v2819_v36, 0.0  ;;  %v615_v40 = vsel %vm494_vm0, %v2818_v37, 0.0 }
  0x46   : > { %v612_v41 = vsel %vm494_vm0, %v2815_v38, 0.0 }
  0x4b   : > { %547 = vadd.xlane.f32.xlu2 %v546_v43  ;;  %544 = vadd.xlane.f32.xlu1 %v543_v44  ;;  %v3024_v43 = vld [vmem:[%s3341_s26 + $0xa8] sm:$0xff]   ;;  %v2676_v44 = vld [vmem:[%s3336_s10 + $0x38] sm:$0xff] }
  0x4c   : > { %541 = vadd.xlane.f32.xlu0 %v540_v45  ;;  %v2826_v45 = vunpack.c.l.bf16 %v3025_v42  ;;  %v2823_v46 = vunpack.c.h.bf16 %v3024_v43  ;;  %v2822_v47 = vunpack.c.l.bf16 %v3024_v43  ;;  %2165 = vmatpush.bf16.msra.mxu0 %v2676_v44  ;;  %v2669_v43 = vld [vmem:[%s3336_s10] sm:$0xff] }
  0x4e   : > { %v627_v49 = vsel %vm494_vm0, %v2826_v45, 0.0  ;;  %v624_v50 = vsel %vm494_vm0, %v2823_v46, 0.0 }
  0x50   : > { %2166 = vmatpush.bf16.msra.mxu0 %v2675_v48 }
  0x53   : > { %556 = vadd.xlane.f32.xlu2 %v555_v51  ;;  %553 = vadd.xlane.f32.xlu1 %v552_v52  ;;  %v621_v51 = vsel %vm494_vm0, %v2822_v47, 0.0  ;;  %v3026_v52 = vld [vmem:[%s3341_s26 + $0xb8] sm:$0xff]  }
  0x54   : > { %550 = vadd.xlane.f32.xlu0 %v549_v53  ;;  %v2674_v53 = vld [vmem:[%s3336_s10 + $0x28] sm:$0xff]  ;;  %v2831_v54 = vunpack.c.h.bf16 %v3026_v52  ;;  %v2830_v55 = vunpack.c.l.bf16 %v3026_v52 }
  0x55   : > { %2167 = vmatpush.bf16.msra.mxu0 %v2674_v53 }
  0x56   : > { %v636_v61 = vsel %vm494_vm0, %v2831_v54, 0.0  ;;  %v633_v62 = vsel %vm494_vm0, %v2830_v55, 0.0 }
  0x5b   : > { %565 = vadd.xlane.f32.xlu2 %v564_v58  ;;  %562 = vadd.xlane.f32.xlu1 %v561_v59 }
  0x5c   : > { %559 = vadd.xlane.f32.xlu0 %v558_v60  ;;  %v2673_v60 = vld [vmem:[%s3336_s10 + $0x20] sm:$0xff] }
  0x5d   : > { %2168 = vmatpush.bf16.msra.mxu0 %v2673_v60 }
  0x63   : > { %574 = vadd.xlane.f32.xlu2 %v573_v2  ;;  %571 = vadd.xlane.f32.xlu1 %v570_v3  ;;  %v1442_v2 = vlaneseq  ;;  %v2838_v3 = vunpack.c.l.bf16 %v3028_v63 }
  0x64   : > { %568 = vadd.xlane.f32.xlu0 %v567_v4  ;;  %v2672_v4 = vld [vmem:[%s3336_s10 + $0x18] sm:$0xff] }
  0x65   : > { %2169 = vmatpush.bf16.msra.mxu0 %v2672_v4  ;;  %v3427_v7 = vand.u32 127, %v1442_v2  ;;  %v645_v13 = vsel %vm494_vm0, %v2838_v3, 0.0 }
  0x67   : > { %v3435_v21 = vadd.s32 4294967288, %v3427_v7  ;;  %v3457_v52 = vadd.s32 4294967264, %v3427_v7  ;;  %v3471_v3 = vadd.s32 4294967240, %v3427_v7 }
  0x69   : > { %2170 = vmatpush.bf16.msra.mxu0 %v2671_v14  ;;  %v3032_v14 = vld [vmem:[%s3341_s26 + $0xe8] sm:$0xff]  }
  0x6b   : > { %583 = vadd.xlane.f32.xlu2 %v582_v9  ;;  %580 = vadd.xlane.f32.xlu1 %v579_v10 }
  0x6c   : > { %577 = vadd.xlane.f32.xlu0 %v576_v11 }
  0x6d   : > { %2171 = vmatpush.bf16.msra.mxu0 %v2670_v27 }
  0x71   : > { %2172 = vmatpush.bf16.msra.mxu0 %v2669_v43  ;;  %v3496_v43 = vld [vmem:[%s3341_s26 + $0xf8] sm:$0xff]  }
  0x73   : > { %592 = vadd.xlane.f32.xlu2 %v591_v17  ;;  %589 = vadd.xlane.f32.xlu1 %v588_v18  ;;  %v642_v17 = vsel %vm494_vm0, %v2835_v5, 0.0  ;;  %v3029_v18 = vld [vmem:[%s3341_s26 + $0xd0] sm:$0xff]  }
  0x74   : > { %586 = vadd.xlane.f32.xlu0 %v585_v19  ;;  %v2842_v30 = vunpack.c.l.bf16 %v3029_v18 }
  0x76   : > { %v651_v47 = vsel %vm494_vm0, %v2842_v30, 0.0 }
  0x7b   : > { %601 = vadd.xlane.f32.xlu2 %v600_v24  ;;  %598 = vadd.xlane.f32.xlu1 %v597_v25  ;;  %v3438_v24 = vadd.s32 4294967280, %v3427_v7 }
  0x7c   : > { %595 = vadd.xlane.f32.xlu0 %v594_v26  ;;  %v2843_v26 = vunpack.c.h.bf16 %v3029_v18 }
  0x7e   : > { %v654_v42 = vsel %vm494_vm0, %v2843_v26, 0.0  ;;  %v2854_v26 = vunpack.c.l.bf16 %v3032_v14 }
  0x83   : > { %610 = vadd.xlane.f32.xlu2 %v609_v32  ;;  %607 = vadd.xlane.f32.xlu1 %v606_v33  ;;  %v2839_v32 = vunpack.c.h.bf16 %v3028_v63  ;;  %v3442_v33 = vadd.s32 4294967272, %v3427_v7 }
  0x84   : > { %604 = vadd.xlane.f32.xlu0 %v603_v34 }
  0x85   : > { %v648_v48 = vsel %vm494_vm0, %v2839_v32, 0.0 }
  0x8b   : > { %619 = vadd.xlane.f32.xlu2 %v618_v39  ;;  %616 = vadd.xlane.f32.xlu1 %v615_v40 }
  0x8c   : > { %613 = vadd.xlane.f32.xlu0 %v612_v41 }
  0x93   : > { %628 = vadd.xlane.f32.xlu2 %v627_v49  ;;  %625 = vadd.xlane.f32.xlu1 %v624_v50  ;;  %v3453_v49 = vld [vmem:[%s3341_s26 + $0xe0] sm:$0xff]   ;;  %v3030_v50 = vld [vmem:[%s3341_s26 + $0xd8] sm:$0xff]  }
  0x94   : > { %622 = vadd.xlane.f32.xlu0 %v621_v51  ;;  %v2850_v56 = vunpack.c.l.bf16 %v3453_v49  ;;  %v2851_v30 = vunpack.c.h.bf16 %v3453_v49 }
  0x96   : > { %v509_v57 = vpop.xlane.xlu2 %508  ;;  %v503_v58 = vpop.xlane.xlu1 %502 }
  0x97   : > { %v497_v59 = vpop.xlane.xlu0 %496  ;;  %v902_v10 = vmul.f32 0.020408163, %v503_v58  ;;  %v904_v31 = vmul.f32 0.020408163, %v509_v57  ;;  %v2847_v57 = vunpack.c.h.bf16 %v3030_v50  ;;  %v3463_v58 = vadd.s32 4294967256, %v3427_v7 }
  0x98   : > { %v900_v15 = vmul.f32 0.020408163, %v497_v59  ;;  %v2846_v59 = vunpack.c.l.bf16 %v3030_v50 }
  0x9b   : > { %637 = vadd.xlane.f32.xlu2 %v636_v61  ;;  %634 = vadd.xlane.f32.xlu1 %v633_v62  ;;  %v3467_v61 = vadd.s32 4294967248, %v3427_v7 }
  0x9c   : > { %631 = vadd.xlane.f32.xlu0 %v630_v0 }
  0x9e   : > { %v512_v8 = vpop.xlane.xlu2 %511  ;;  %v506_v9 = vpop.xlane.xlu1 %505 }
  0x9f   : > { %v903_v11 = vmul.f32 0.020408163, %v506_v9  ;;  %v500_v12 = vpop.xlane.xlu0 %499  ;;  %v905_v23 = vmul.f32 0.020408163, %v512_v8  ;;  %v663_v8 = vsel %vm494_vm0, %v2850_v56, 0.0  ;;  %v660_v9 = vsel %vm494_vm0, %v2847_v57, 0.0 }
  0xa0   : > { %v901_v16 = vmul.f32 0.020408163, %v500_v12  ;;  %v3477_v12 = vadd.s32 4294967232, %v3427_v7  ;;  %v3509_v56 = vadd.s32 4294967208, %v3427_v7  ;;  %v3512_v57 = vadd.s32 4294967200, %v3427_v7 }
  0xa1   : > { %v1037_v19 = vpack.c.bf16 %v903_v11, %v902_v10  ;;  %v1038_v38 = vpack.c.bf16 %v905_v23, %v904_v31 }
  0xa2   : > { %v1036_v22 = vpack.c.bf16 %v901_v16, %v900_v15 }
  0xa3   : > { %v1309_v25 = vunpack.c.l.b16 %v1037_v19  ;;  %646 = vadd.xlane.f32.xlu2 %v645_v13  ;;  %643 = vadd.xlane.f32.xlu1 %v642_v17  ;;  %v1310_v44 = vunpack.c.h.b16 %v1037_v19  ;;  %v1311_v53 = vunpack.c.l.b16 %v1038_v38  ;;  %v1312_v1 = vunpack.c.h.b16 %v1038_v38 }
  0xa4   : > { %v1307_v28 = vunpack.c.l.b16 %v1036_v22  ;;  %v1308_v29 = vunpack.c.h.b16 %v1036_v22  ;;  %640 = vadd.xlane.f32.xlu0 %v639_v20  ;;  %v657_v13 = vsel %vm494_vm0, %v2846_v59, 0.0  ;;  %v2684_v20 = vld [vmem:[%s3336_s10 + $0x78] sm:$0xff]  ;;  %v3485_v22 = vadd.s32 4294967224, %v3427_v7 }
  0xa5   : > { %v1450_v39 = vperm.slane %v1309_v25, %v3438_v24  ;;  %v1454_v55 = vperm.slane %v1310_v44, %v3442_v33  ;;  %v1458_v2 = vperm.slane %v1311_v53, %v3457_v52  ;;  %v1462_v19 = vperm.slane %v1312_v1, %v3463_v58  ;;  %2178 = vmatpush.bf16.msra.mxu1 %v2684_v20  ;;  %v3033_v44 = vld [vmem:[%s3341_s26 + $0xf0] sm:$0xff]  }
  0xa6   : > { %v1444_v34 = vperm.slane %v1307_v28, %v3427_v7  ;;  %v1446_v35 = vperm.slane %v1308_v29, %v3435_v21  ;;  %v521_v36 = vpop.xlane.xlu2 %520  ;;  %v518_v37 = vpop.xlane.xlu1 %517  ;;  %v2855_v25 = vunpack.c.h.bf16 %v3032_v14  ;;  %v2862_v53 = vunpack.c.l.bf16 %v3496_v43 }
  0xa7   : > { %v907_v40 = vmul.f32 0.020408163, %v518_v37  ;;  %v515_v41 = vpop.xlane.xlu0 %514  ;;  %v908_v5 = vmul.f32 0.020408163, %v521_v36  ;;  %v3517_v1 = vadd.s32 4294967192, %v3427_v7 }
  0xa8   : > { %v1448_v45 = vsel %vm1447_vm1, %v1446_v35, %v1444_v34  ;;  %v906_v46 = vmul.f32 0.020408163, %v515_v41  ;;  %v672_v41 = vsel %vm494_vm0, %v2855_v25, 0.0 }
  0xa9   : > { %v1452_v54 = vsel %vm1451_vm2, %v1450_v39, %v1448_v45  ;;  %v2683_v39 = vld [vmem:[%s3336_s10 + $0x70] sm:$0xff] }
  0xaa   : > { %v1039_v51 = vpack.c.bf16 %v907_v40, %v906_v46  ;;  %v1456_v60 = vsel %vm1455_vm3, %v1454_v55, %v1452_v54  ;;  %v3501_v46 = vadd.s32 4294967216, %v3427_v7  ;;  %2179 = vmatpush.bf16.msra.mxu1 %v2683_v39  ;;  %v2859_v54 = vunpack.c.h.bf16 %v3033_v44  ;;  %v2682_v55 = vld [vmem:[%s3336_s10 + $0x68] sm:$0xff] }
  0xab   : > { %655 = vadd.xlane.f32.xlu2 %v654_v42  ;;  %652 = vadd.xlane.f32.xlu1 %v651_v47  ;;  %v1460_v10 = vsel %vm1459_vm4, %v1458_v2, %v1456_v60  ;;  %v669_v42 = vsel %vm494_vm0, %v2854_v26, 0.0 }
  0xac   : > { %649 = vadd.xlane.f32.xlu0 %v648_v48  ;;  %v1313_v62 = vunpack.c.l.b16 %v1039_v51  ;;  %v1314_v11 = vunpack.c.h.b16 %v1039_v51  ;;  %v1464_v27 = vsel %vm1463_vm5, %v1462_v19, %v1460_v10  ;;  %v666_v48 = vsel %vm494_vm0, %v2851_v30, 0.0  ;;  %v2681_v10 = vld [vmem:[%s3336_s10 + $0x60] sm:$0xff] }
  0xad   : > { %v3528_v19 = vadd.s32 4294967184, %v3427_v7 }
  0xae   : > { %v530_v63 = vpop.xlane.xlu2 %529  ;;  %v527_v0 = vpop.xlane.xlu1 %526  ;;  %v1466_v15 = vperm.slane %v1313_v62, %v3467_v61  ;;  %v1470_v28 = vperm.slane %v1314_v11, %v3471_v3  ;;  %2180 = vmatpush.bf16.msra.mxu1 %v2682_v55  ;;  %v3036_v55 = vld [vmem:[%s3341_s26 + $0x108] sm:$0xff]  }
  0xaf   : > { %v524_v4 = vpop.xlane.xlu0 %523  ;;  %v911_v16 = vmul.f32 0.020408163, %v530_v63  ;;  %v910_v17 = vmul.f32 0.020408163, %v527_v0  ;;  %v2858_v63 = vunpack.c.l.bf16 %v3033_v44 }
  0xb0   : > { %v909_v6 = vmul.f32 0.020408163, %v524_v4  ;;  %v1468_v31 = vsel %vm1467_vm6, %v1466_v15, %v1464_v27  ;;  %v3035_v15 = vld [vmem:[%s3341_s26 + $0x100] sm:$0xff]  }
  0xb1   : > { %v1041_v32 = vpack.c.bf16 %v911_v16, %v910_v17  ;;  %v1472_v45 = vsel %vm1471_vm7, %v1470_v28, %v1468_v31  ;;  %v2867_v26 = vunpack.c.h.bf16 %v3035_v15  ;;  %v2680_v28 = vld [vmem:[%s3336_s10 + $0x58] sm:$0xff]  ;;  %v2866_v31 = vunpack.c.l.bf16 %v3035_v15 }
  0xb2   : > { %v1040_v18 = vpack.c.bf16 %v909_v6, %v908_v5  ;;  %2181 = vmatpush.bf16.msra.mxu1 %v2681_v10 }
  0xb3   : > { %664 = vadd.xlane.f32.xlu2 %v663_v8  ;;  %661 = vadd.xlane.f32.xlu1 %v660_v9  ;;  %v1317_v49 = vunpack.c.l.b16 %v1041_v32  ;;  %v1318_v60 = vunpack.c.h.b16 %v1041_v32  ;;  %v681_v8 = vsel %vm494_vm0, %v2862_v53, 0.0  ;;  %v678_v9 = vsel %vm494_vm0, %v2859_v54, 0.0  ;;  %v3037_v54 = vld [vmem:[%s3341_s26 + $0x110] sm:$0xff]  }
  0xb4   : > { %v1315_v23 = vunpack.c.l.b16 %v1040_v18  ;;  %658 = vadd.xlane.f32.xlu0 %v657_v13  ;;  %v1316_v29 = vunpack.c.h.b16 %v1040_v18  ;;  %v675_v18 = vsel %vm494_vm0, %v2858_v63, 0.0  ;;  %v2874_v63 = vunpack.c.l.bf16 %v3037_v54 }
  0xb5   : > { %v1482_v0 = vperm.slane %v1317_v49, %v3501_v46  ;;  %v1486_v17 = vperm.slane %v1318_v60, %v3509_v56 }
  0xb6   : > { %v1474_v34 = vperm.slane %v1315_v23, %v3477_v12  ;;  %v539_v35 = vpop.xlane.xlu2 %538  ;;  %v536_v36 = vpop.xlane.xlu1 %535  ;;  %v1478_v47 = vperm.slane %v1316_v29, %v3485_v22  ;;  %v3531_v23 = vadd.s32 4294967176, %v3427_v7  ;;  %2182 = vmatpush.bf16.msra.mxu1 %v2680_v28  ;;  %v699_v15 = vsel %vm494_vm0, %v2874_v63, 0.0 }
  0xb7   : > { %v913_v37 = vmul.f32 0.020408163, %v536_v36  ;;  %v533_v38 = vpop.xlane.xlu0 %532  ;;  %v914_v11 = vmul.f32 0.020408163, %v539_v35  ;;  %v2863_v36 = vunpack.c.h.bf16 %v3496_v43  ;;  %v690_v43 = vsel %vm494_vm0, %v2867_v26, 0.0  ;;  %v3038_v26 = vld [vmem:[%s3341_s26 + $0x118] sm:$0xff]  }
  0xb8   : > { %v912_v40 = vmul.f32 0.020408163, %v533_v38  ;;  %v1476_v50 = vsel %vm1475_vm8, %v1474_v34, %v1472_v45  ;;  %v2679_v45 = vld [vmem:[%s3336_s10 + $0x50] sm:$0xff] }
  0xb9   : > { %v1480_v62 = vsel %vm1479_vm9, %v1478_v47, %v1476_v50 }
  0xba   : > { %v1042_v51 = vpack.c.bf16 %v913_v37, %v912_v40  ;;  %v1484_v16 = vsel %vm1483_vm10, %v1482_v0, %v1480_v62  ;;  %2183 = vmatpush.bf16.msra.mxu1 %v2679_v45  ;;  %v2678_v62 = vld [vmem:[%s3336_s10 + $0x48] sm:$0xff]  ;;  %v2871_v0 = vunpack.c.h.bf16 %v3036_v55 }
  0xbb   : > { %673 = vadd.xlane.f32.xlu2 %v672_v41  ;;  %670 = vadd.xlane.f32.xlu1 %v669_v42  ;;  %v1488_v27 = vsel %vm1487_vm11, %v1486_v17, %v1484_v16 }
  0xbc   : > { %v1319_v59 = vunpack.c.l.b16 %v1042_v51  ;;  %667 = vadd.xlane.f32.xlu0 %v666_v48  ;;  %v1320_v5 = vunpack.c.h.b16 %v1042_v51  ;;  %v687_v48 = vsel %vm494_vm0, %v2866_v31, 0.0  ;;  %v684_v51 = vsel %vm494_vm0, %v2863_v36, 0.0 }
  0xbd   : > { %v696_v16 = vsel %vm494_vm0, %v2871_v0, 0.0 }
  0xbe   : > { %v548_v2 = vpop.xlane.xlu2 %547  ;;  %v545_v4 = vpop.xlane.xlu1 %544  ;;  %v1490_v13 = vperm.slane %v1319_v59, %v3512_v57  ;;  %v1494_v25 = vperm.slane %v1320_v5, %v3517_v1  ;;  %v2870_v5 = vunpack.c.l.bf16 %v3036_v55  ;;  %2184 = vmatpush.bf16.msra.mxu1 %v2678_v62 }
  0xbf   : > { %v542_v6 = vpop.xlane.xlu0 %541  ;;  %v917_v34 = vmul.f32 0.020408163, %v548_v2  ;;  %v916_v35 = vmul.f32 0.020408163, %v545_v4 }
  0xc0   : > { %v915_v14 = vmul.f32 0.020408163, %v542_v6  ;;  %v1492_v32 = vsel %vm1491_vm12, %v1490_v13, %v1488_v27 }
  0xc1   : > { %v1496_v44 = vsel %vm1495_vm13, %v1494_v25, %v1492_v32  ;;  %v1044_v50 = vpack.c.bf16 %v917_v34, %v916_v35  ;;  %v693_v25 = vsel %vm494_vm0, %v2870_v5, 0.0  ;;  %v2879_v32 = vunpack.c.h.bf16 %v3038_v26 }
  0xc2   : > { %v1043_v20 = vpack.c.bf16 %v915_v14, %v914_v11  ;;  %v2677_v11 = vld [vmem:[%s3336_s10 + $0x40] sm:$0xff]  ;;  %v2878_v34 = vunpack.c.l.bf16 %v3038_v26 }
  0xc3   : > { %682 = vadd.xlane.f32.xlu2 %v681_v8  ;;  %679 = vadd.xlane.f32.xlu1 %v678_v9  ;;  %v1323_v2 = vunpack.c.l.b16 %v1044_v50  ;;  %v1324_v4 = vunpack.c.h.b16 %v1044_v50 }
  0xc4   : > { %v1321_v29 = vunpack.c.l.b16 %v1043_v20  ;;  %v1322_v30 = vunpack.c.h.b16 %v1043_v20  ;;  %676 = vadd.xlane.f32.xlu0 %v675_v18  ;;  %2185 = vmatpush.bf16.msra.mxu1 %v2677_v11  ;;  %v705_v50 = vsel %vm494_vm0, %v2878_v34, 0.0 }
  0xc5   : > { %v1505_v17 = vperm.slane %v1323_v2, %v3427_v7  ;;  %v1506_v18 = vperm.slane %v1324_v4, %v3435_v21 }
  0xc6   : > { %v1498_v37 = vperm.slane %v1321_v29, %v3528_v19  ;;  %v557_v38 = vpop.xlane.xlu2 %556  ;;  %v554_v39 = vpop.xlane.xlu1 %553  ;;  %v1502_v40 = vperm.slane %v1322_v30, %v3531_v23 }
  0xc7   : > { %v919_v41 = vmul.f32 0.020408163, %v554_v39  ;;  %v551_v42 = vpop.xlane.xlu0 %550  ;;  %v920_v13 = vmul.f32 0.020408163, %v557_v38  ;;  %v1507_v35 = vsel %vm1447_vm1, %v1506_v18, %v1505_v17  ;;  %v2875_v38 = vunpack.c.h.bf16 %v3037_v54 }
  0xc8   : > { %v918_v47 = vmul.f32 0.020408163, %v551_v42  ;;  %v1500_v49 = vsel %vm1499_vm14, %v1498_v37, %v1496_v44 }
  0xc9   : > { %v1504_v53 = vsel %vm1503_vm15, %v1502_v40, %v1500_v49  ;;  %v708_v49 = vsel %vm494_vm0, %v2879_v32, 0.0  ;;  %v702_v55 = vsel %vm494_vm0, %v2875_v38, 0.0 }
  0xca   : > { %v1045_v59 = vpack.c.bf16 %v919_v41, %v918_v47  ;;  %v1735_v60 = vpack.c.b16 %v1504_v53, %v1504_v53 }
  0xcb   : > { %691 = vadd.xlane.f32.xlu2 %v690_v43  ;;  %688 = vadd.xlane.f32.xlu1 %v687_v48  ;;  %v3563_v43 = vld [vmem:[%s3341_s26 + $0x128] sm:$0xff]  }
  0xcc   : > { %685 = vadd.xlane.f32.xlu0 %v684_v51  ;;  %2173 = vmatmul.bf16.vlgmr.msra.gmra.mxu0 %v1735_v60  ;;  %v1325_v6 = vunpack.c.l.b16 %v1045_v59  ;;  %v1326_v20 = vunpack.c.h.b16 %v1045_v59  ;;  %v3039_v51 = vld [vmem:[%s3341_s26 + $0x120] sm:$0xff]   ;;  %v2886_v63 = vunpack.c.l.bf16 %v3563_v43 }
  0xcd   : > { %v2883_v0 = vunpack.c.h.bf16 %v3039_v51 }
  0xce   : > { %v566_v8 = vpop.xlane.xlu2 %565  ;;  %v563_v9 = vpop.xlane.xlu1 %562  ;;  %v1508_v27 = vperm.slane %v1325_v6, %v3438_v24  ;;  %v1510_v36 = vperm.slane %v1326_v20, %v3442_v33  ;;  %v2882_v6 = vunpack.c.l.bf16 %v3039_v51 }
  0xcf   : > { %v560_v10 = vpop.xlane.xlu0 %559  ;;  %v923_v28 = vmul.f32 0.020408163, %v566_v8  ;;  %v922_v29 = vmul.f32 0.020408163, %v563_v9  ;;  %v2692_v8 = vld [vmem:[%s3336_s10 + $0xb8] sm:$0xff]  ;;  %v714_v18 = vsel %vm494_vm0, %v2883_v0, 0.0 }
  0xd0   : > { %v921_v14 = vmul.f32 0.020408163, %v560_v10  ;;  %v1509_v39 = vsel %vm1451_vm2, %v1508_v27, %v1507_v35  ;;  %2191 = vmatpush.bf16.msra.mxu2 %v2692_v8 }
  0xd1   : > { %v1047_v40 = vpack.c.bf16 %v923_v28, %v922_v29  ;;  %v1511_v53 = vsel %vm1455_vm3, %v1510_v36, %v1509_v39  ;;  %v3051_v28 = vld [vmem:[%s3341_s26 + $0x180] sm:$0xff]  }
  0xd2   : > { %v1046_v30 = vpack.c.bf16 %v921_v14, %v920_v13  ;;  %v717_v13 = vsel %vm494_vm0, %v2886_v63, 0.0  ;;  %v3052_v63 = vld [vmem:[%s3341_s26 + $0x188] sm:$0xff]  }
  0xd3   : > { %700 = vadd.xlane.f32.xlu2 %v699_v15  ;;  %697 = vadd.xlane.f32.xlu1 %v696_v16  ;;  %v1329_v59 = vunpack.c.l.b16 %v1047_v40  ;;  %v1330_v4 = vunpack.c.h.b16 %v1047_v40 }
  0xd4   : > { %v1327_v31 = vunpack.c.l.b16 %v1046_v30  ;;  %694 = vadd.xlane.f32.xlu0 %v693_v25  ;;  %v1328_v37 = vunpack.c.h.b16 %v1046_v30  ;;  %v711_v30 = vsel %vm494_vm0, %v2882_v6, 0.0 }
  0xd5   : > { %v1516_v9 = vperm.slane %v1329_v59, %v3467_v61  ;;  %v1518_v29 = vperm.slane %v1330_v4, %v3471_v3 }
  0xd6   : > { %v1512_v41 = vperm.slane %v1327_v31, %v3457_v52  ;;  %v575_v42 = vpop.xlane.xlu2 %574  ;;  %v572_v44 = vpop.xlane.xlu1 %571  ;;  %v1514_v54 = vperm.slane %v1328_v37, %v3463_v58  ;;  %v2691_v31 = vld [vmem:[%s3336_s10 + $0xb0] sm:$0xff]  ;;  %v2931_v37 = vunpack.c.h.bf16 %v3051_v28 }
  0xd7   : > { %v925_v45 = vmul.f32 0.020408163, %v572_v44  ;;  %v569_v47 = vpop.xlane.xlu0 %568  ;;  %v926_v25 = vmul.f32 0.020408163, %v575_v42  ;;  %2192 = vmatpush.bf16.msra.mxu2 %v2691_v31  ;;  %v2887_v42 = vunpack.c.h.bf16 %v3563_v43  ;;  %v2690_v44 = vld [vmem:[%s3336_s10 + $0xa8] sm:$0xff] }
  0xd8   : > { %v924_v48 = vmul.f32 0.020408163, %v569_v47  ;;  %v1513_v60 = vsel %vm1459_vm4, %v1512_v41, %v1511_v53  ;;  %v2930_v41 = vunpack.c.l.bf16 %v3051_v28 }
  0xd9   : > { %v1515_v5 = vsel %vm1463_vm5, %v1514_v54, %v1513_v60  ;;  %v786_v60 = vsel %vm494_vm0, %v2931_v37, 0.0 }
  0xda   : > { %v1048_v62 = vpack.c.bf16 %v925_v45, %v924_v48  ;;  %v1517_v20 = vsel %vm1467_vm6, %v1516_v9, %v1515_v5  ;;  %v783_v43 = vsel %vm494_vm0, %v2930_v41, 0.0  ;;  %v2689_v5 = vld [vmem:[%s3336_s10 + $0xa0] sm:$0xff] }
  0xdb   : > { %709 = vadd.xlane.f32.xlu2 %v708_v49  ;;  %706 = vadd.xlane.f32.xlu1 %v705_v50  ;;  %v1519_v35 = vsel %vm1471_vm7, %v1518_v29, %v1517_v20 }
  0xdc   : > { %v1331_v2 = vunpack.c.l.b16 %v1048_v62  ;;  %703 = vadd.xlane.f32.xlu0 %v702_v55  ;;  %v1332_v14 = vunpack.c.h.b16 %v1048_v62  ;;  %v3059_v62 = vld [vmem:[%s3341_s26 + $0x1c0] sm:$0xff]   ;;  %2193 = vmatpush.bf16.msra.mxu2 %v2690_v44 }
  0xdd   : > { %v2962_v9 = vunpack.c.l.bf16 %v3059_v62 }
  0xde   : > { %v584_v10 = vpop.xlane.xlu2 %583  ;;  %v581_v11 = vpop.xlane.xlu1 %580  ;;  %v1520_v26 = vperm.slane %v1331_v2, %v3477_v12  ;;  %v1522_v36 = vperm.slane %v1332_v14, %v3485_v22  ;;  %v720_v2 = vsel %vm494_vm0, %v2887_v42, 0.0  ;;  %v2934_v14 = vunpack.c.l.bf16 %v3052_v63 }
  0xdf   : > { %v929_v15 = vmul.f32 0.020408163, %v584_v10  ;;  %v928_v16 = vmul.f32 0.020408163, %v581_v11  ;;  %v578_v17 = vpop.xlane.xlu0 %577  ;;  %v2935_v10 = vunpack.c.h.bf16 %v3052_v63  ;;  %v831_v28 = vsel %vm494_vm0, %v2962_v9, 0.0 }
  0xe0   : > { %v927_v27 = vmul.f32 0.020408163, %v578_v17  ;;  %v1521_v38 = vsel %vm1475_vm8, %v1520_v26, %v1519_v35  ;;  %2194 = vmatpush.bf16.msra.mxu2 %v2689_v5  ;;  %v2688_v17 = vld [vmem:[%s3336_s10 + $0x98] sm:$0xff]  ;;  %v3060_v5 = vld [vmem:[%s3341_s26 + $0x1c8] sm:$0xff]  }
  0xe1   : > { %v1050_v32 = vpack.c.bf16 %v929_v15, %v928_v16  ;;  %v1523_v51 = vsel %vm1479_vm9, %v1522_v36, %v1521_v38  ;;  %v792_v29 = vsel %vm494_vm0, %v2935_v10, 0.0 }
  0xe2   : > { %v1049_v34 = vpack.c.bf16 %v927_v27, %v926_v25 }
  0xe3   : > { %718 = vadd.xlane.f32.xlu2 %v717_v13  ;;  %715 = vadd.xlane.f32.xlu1 %v714_v18  ;;  %v1335_v45 = vunpack.c.l.b16 %v1050_v32  ;;  %v1336_v0 = vunpack.c.h.b16 %v1050_v32 }
  0xe4   : > { %v1333_v39 = vunpack.c.l.b16 %v1049_v34  ;;  %v1334_v40 = vunpack.c.h.b16 %v1049_v34  ;;  %712 = vadd.xlane.f32.xlu0 %v711_v30  ;;  %v789_v34 = vsel %vm494_vm0, %v2934_v14, 0.0  ;;  %2195 = vmatpush.bf16.msra.mxu2 %v2688_v17  ;;  %v2966_v14 = vunpack.c.l.bf16 %v3060_v5 }
  0xe5   : > { %v1528_v6 = vperm.slane %v1335_v45, %v3512_v57  ;;  %v1530_v16 = vperm.slane %v1336_v0, %v3517_v1 }
  0xe6   : > { %v1524_v47 = vperm.slane %v1333_v39, %v3501_v46  ;;  %v1526_v48 = vperm.slane %v1334_v40, %v3509_v56  ;;  %v593_v49 = vpop.xlane.xlu2 %592  ;;  %v590_v50 = vpop.xlane.xlu1 %589  ;;  %v3041_v39 = vld [vmem:[%s3341_s26 + $0x130] sm:$0xff]  }
  0xe7   : > { %v931_v53 = vmul.f32 0.020408163, %v590_v50  ;;  %v587_v54 = vpop.xlane.xlu0 %586  ;;  %v932_v31 = vmul.f32 0.020408163, %v593_v49  ;;  %v2687_v40 = vld [vmem:[%s3336_s10 + $0x90] sm:$0xff]  ;;  %v2891_v44 = vunpack.c.h.bf16 %v3041_v39  ;;  %v2890_v45 = vunpack.c.l.bf16 %v3041_v39  ;;  %v2686_v49 = vld [vmem:[%s3336_s10 + $0x88] sm:$0xff] }
  0xe8   : > { %v1525_v55 = vsel %vm1483_vm10, %v1524_v47, %v1523_v51  ;;  %v930_v59 = vmul.f32 0.020408163, %v587_v54  ;;  %2196 = vmatpush.bf16.msra.mxu2 %v2687_v40 }
  0xe9   : > { %v1527_v4 = vsel %vm1487_vm11, %v1526_v48, %v1525_v55  ;;  %v2963_v48 = vunpack.c.h.bf16 %v3059_v62  ;;  %v723_v63 = vsel %vm494_vm0, %v2890_v45, 0.0  ;;  %v2685_v62 = vld [vmem:[%s3336_s10 + $0x80] sm:$0xff] }
  0xea   : > { %v1051_v8 = vpack.c.bf16 %v931_v53, %v930_v59  ;;  %v1529_v15 = vsel %vm1491_vm12, %v1528_v6, %v1527_v4  ;;  %v3053_v4 = vld [vmem:[%s3341_s26 + $0x190] sm:$0xff]  }
  0xeb   : > { %787 = vadd.xlane.f32.xlu2 %v786_v60  ;;  %784 = vadd.xlane.f32.xlu1 %v783_v43  ;;  %v1531_v30 = vsel %vm1495_vm13, %v1530_v16, %v1529_v15  ;;  %v726_v43 = vsel %vm494_vm0, %v2891_v44, 0.0  ;;  %v2938_v10 = vunpack.c.l.bf16 %v3053_v4 }
  0xec   : > { %v1337_v11 = vunpack.c.l.b16 %v1051_v8  ;;  %v1338_v13 = vunpack.c.h.b16 %v1051_v8  ;;  %721 = vadd.xlane.f32.xlu0 %v720_v2  ;;  %v834_v2 = vsel %vm494_vm0, %v2963_v48, 0.0  ;;  %2197 = vmatpush.bf16.msra.mxu2 %v2686_v49  ;;  %v2939_v48 = vunpack.c.h.bf16 %v3053_v4 }
  0xee   : > { %v1532_v18 = vperm.slane %v1337_v11, %v3528_v19  ;;  %v602_v20 = vpop.xlane.xlu2 %601  ;;  %v599_v25 = vpop.xlane.xlu1 %598  ;;  %v1534_v26 = vperm.slane %v1338_v13, %v3531_v23  ;;  %v2967_v11 = vunpack.c.h.bf16 %v3060_v5 }
  0xef   : > { %v596_v27 = vpop.xlane.xlu0 %595  ;;  %v935_v36 = vmul.f32 0.020408163, %v602_v20  ;;  %v934_v37 = vmul.f32 0.020408163, %v599_v25 }
  0xf0   : > { %v933_v32 = vmul.f32 0.020408163, %v596_v27  ;;  %v1533_v35 = vsel %vm1499_vm14, %v1532_v18, %v1531_v30  ;;  %2198 = vmatpush.bf16.msra.mxu2 %v2685_v62  ;;  %v798_v62 = vsel %vm494_vm0, %v2939_v48, 0.0 }
  0xf1   : > { %v1535_v38 = vsel %vm1503_vm15, %v1534_v26, %v1533_v35  ;;  %v1053_v47 = vpack.c.bf16 %v935_v36, %v934_v37 }
  0xf2   : > { %v1052_v41 = vpack.c.bf16 %v933_v32, %v932_v31  ;;  %v1736_v42 = vpack.c.b16 %v1535_v38, %v1535_v38  ;;  %v837_v32 = vsel %vm494_vm0, %v2966_v14, 0.0 }
  0xf3   : > { %832 = vadd.xlane.f32.xlu2 %v831_v28  ;;  %793 = vadd.xlane.f32.xlu1 %v792_v29  ;;  %v1341_v0 = vunpack.c.l.b16 %v1053_v47  ;;  %v1342_v20 = vunpack.c.h.b16 %v1053_v47  ;;  %v795_v28 = vsel %vm494_vm0, %v2938_v10, 0.0  ;;  %v840_v29 = vsel %vm494_vm0, %v2967_v11, 0.0 }
  0xf4   : > { %790 = vadd.xlane.f32.xlu0 %v789_v34  ;;  %2186 = vmatmul.bf16.vlgmr.msra.gmra.mxu1 %v1736_v42  ;;  %v1339_v50 = vunpack.c.l.b16 %v1052_v41  ;;  %v1340_v51 = vunpack.c.h.b16 %v1052_v41  ;;  %v3042_v34 = vld [vmem:[%s3341_s26 + $0x138] sm:$0xff]  }
  0xf5   : > { %v1539_v13 = vperm.slane %v1341_v0, %v3438_v24  ;;  %v1541_v39 = vperm.slane %v1342_v20, %v3442_v33  ;;  %v2895_v41 = vunpack.c.h.bf16 %v3042_v34  ;;  %v2894_v42 = vunpack.c.l.bf16 %v3042_v34 }
  0xf6   : > { %v611_v53 = vpop.xlane.xlu2 %610  ;;  %v608_v54 = vpop.xlane.xlu1 %607  ;;  %v1536_v6 = vperm.slane %v1339_v50, %v3427_v7  ;;  %v1537_v8 = vperm.slane %v1340_v51, %v3435_v21 }
  0xf7   : > { %v937_v55 = vmul.f32 0.020408163, %v608_v54  ;;  %v605_v59 = vpop.xlane.xlu0 %604  ;;  %v938_v26 = vmul.f32 0.020408163, %v611_v53  ;;  %v729_v0 = vsel %vm494_vm0, %v2894_v42, 0.0 }
  0xf8   : > { %v936_v60 = vmul.f32 0.020408163, %v605_v59  ;;  %v1538_v15 = vsel %vm1447_vm1, %v1537_v8, %v1536_v6 }
  0xf9   : > { %v1540_v30 = vsel %vm1451_vm2, %v1539_v13, %v1538_v15  ;;  %v2700_v13 = vld [vmem:[%s3336_s10 + $0xf8] sm:$0xff] }
  0xfa   : > { %v1054_v9 = vpack.c.bf16 %v937_v55, %v936_v60  ;;  %v1542_v44 = vsel %vm1455_vm3, %v1541_v39, %v1540_v30  ;;  %v3637_v60 = vld [vmem:[%s3341_s26 + $0x1d0] sm:$0xff]   ;;  %2204 = vmatpush.bf16.msra.mxu3 %v2700_v13 }
  0xfb   : > { %727 = vadd.xlane.f32.xlu2 %v726_v43  ;;  %724 = vadd.xlane.f32.xlu1 %v723_v63  ;;  %v732_v63 = vsel %vm494_vm0, %v2895_v41, 0.0  ;;  %v2970_v10 = vunpack.c.l.bf16 %v3637_v60 }
  0xfc   : > { %835 = vadd.xlane.f32.xlu0 %v834_v2  ;;  %v1343_v16 = vunpack.c.l.b16 %v1054_v9  ;;  %v1344_v31 = vunpack.c.h.b16 %v1054_v9  ;;  %v3043_v2 = vld [vmem:[%s3341_s26 + $0x140] sm:$0xff]  }
  0xfd   : > { %v2899_v11 = vunpack.c.h.bf16 %v3043_v2 }
  0xfe   : > { %v620_v17 = vpop.xlane.xlu2 %619  ;;  %v617_v18 = vpop.xlane.xlu1 %616  ;;  %v1543_v35 = vperm.slane %v1343_v16, %v3457_v52  ;;  %v1545_v45 = vperm.slane %v1344_v31, %v3463_v58 }
  0xff   : > { %v614_v25 = vpop.xlane.xlu0 %613  ;;  %v941_v36 = vmul.f32 0.020408163, %v620_v17  ;;  %v940_v37 = vmul.f32 0.020408163, %v617_v18  ;;  %v2898_v17 = vunpack.c.l.bf16 %v3043_v2  ;;  %v738_v31 = vsel %vm494_vm0, %v2899_v11, 0.0 }
 0x100   : > { %v939_v27 = vmul.f32 0.020408163, %v614_v25  ;;  %v1544_v49 = vsel %vm1459_vm4, %v1543_v35, %v1542_v44 }
 0x101   : > { %v1056_v50 = vpack.c.bf16 %v941_v36, %v940_v37  ;;  %v1546_v4 = vsel %vm1463_vm5, %v1545_v45, %v1544_v49  ;;  %v735_v41 = vsel %vm494_vm0, %v2898_v17, 0.0  ;;  %v2698_v49 = vld [vmem:[%s3336_s10 + $0xe8] sm:$0xff] }
 0x102   : > { %v1055_v38 = vpack.c.bf16 %v939_v27, %v938_v26  ;;  %v843_v26 = vsel %vm494_vm0, %v2970_v10, 0.0 }
 0x103   : > { %796 = vadd.xlane.f32.xlu2 %v795_v28  ;;  %841 = vadd.xlane.f32.xlu1 %v840_v29  ;;  %v1347_v6 = vunpack.c.l.b16 %v1056_v50  ;;  %v1348_v15 = vunpack.c.h.b16 %v1056_v50 }
 0x104   : > { %v1345_v40 = vunpack.c.l.b16 %v1055_v38  ;;  %838 = vadd.xlane.f32.xlu0 %v837_v32  ;;  %v1346_v47 = vunpack.c.h.b16 %v1055_v38  ;;  %v2699_v32 = vld [vmem:[%s3336_s10 + $0xf0] sm:$0xff]  ;;  %v3044_v38 = vld [vmem:[%s3341_s26 + $0x148] sm:$0xff]  }
 0x105   : > { %v1551_v18 = vperm.slane %v1347_v6, %v3477_v12  ;;  %v1553_v39 = vperm.slane %v1348_v15, %v3485_v22  ;;  %2205 = vmatpush.bf16.msra.mxu3 %v2699_v32  ;;  %v2902_v48 = vunpack.c.l.bf16 %v3044_v38  ;;  %v3054_v15 = vld [vmem:[%s3341_s26 + $0x198] sm:$0xff]  }
 0x106   : > { %v1547_v51 = vperm.slane %v1345_v40, %v3467_v61  ;;  %v629_v53 = vpop.xlane.xlu2 %628  ;;  %v626_v54 = vpop.xlane.xlu1 %625  ;;  %v1549_v5 = vperm.slane %v1346_v47, %v3471_v3  ;;  %v2903_v47 = vunpack.c.h.bf16 %v3044_v38 }
 0x107   : > { %v943_v55 = vmul.f32 0.020408163, %v626_v54  ;;  %v623_v59 = vpop.xlane.xlu0 %622  ;;  %v944_v35 = vmul.f32 0.020408163, %v629_v53 }
 0x108   : > { %v942_v43 = vmul.f32 0.020408163, %v623_v59  ;;  %v1548_v8 = vsel %vm1467_vm6, %v1547_v51, %v1546_v4  ;;  %v2971_v59 = vunpack.c.h.bf16 %v3637_v60  ;;  %v741_v60 = vsel %vm494_vm0, %v2902_v48, 0.0 }
 0x109   : > { %v1550_v16 = vsel %vm1471_vm7, %v1549_v5, %v1548_v8  ;;  %2206 = vmatpush.bf16.msra.mxu3 %v2698_v49  ;;  %v744_v8 = vsel %vm494_vm0, %v2903_v47, 0.0  ;;  %v2694_v49 = vld [vmem:[%s3336_s10 + $0xc8] sm:$0xff] }
 0x10a   : > { %v1057_v9 = vpack.c.bf16 %v943_v55, %v942_v43  ;;  %v1552_v34 = vsel %vm1475_vm8, %v1551_v18, %v1550_v16  ;;  %v846_v10 = vsel %vm494_vm0, %v2971_v59, 0.0 }
 0x10b   : > { %733 = vadd.xlane.f32.xlu2 %v732_v63  ;;  %730 = vadd.xlane.f32.xlu1 %v729_v0  ;;  %v1554_v44 = vsel %vm1479_vm9, %v1553_v39, %v1552_v34 }
 0x10c   : > { %v1349_v14 = vunpack.c.l.b16 %v1057_v9  ;;  %799 = vadd.xlane.f32.xlu0 %v798_v62  ;;  %v1350_v27 = vunpack.c.h.b16 %v1057_v9  ;;  %v2697_v62 = vld [vmem:[%s3336_s10 + $0xe0] sm:$0xff] }
 0x10d   : > { %2207 = vmatpush.bf16.msra.mxu3 %v2697_v62 }
 0x10e   : > { %v638_v20 = vpop.xlane.xlu2 %637  ;;  %v635_v25 = vpop.xlane.xlu1 %634  ;;  %v1555_v36 = vperm.slane %v1349_v14, %v3501_v46  ;;  %v1557_v45 = vperm.slane %v1350_v27, %v3509_v56  ;;  %v3062_v14 = vld [vmem:[%s3341_s26 + $0x1d8] sm:$0xff]  }
 0x10f   : > { %v947_v28 = vmul.f32 0.020408163, %v638_v20  ;;  %v946_v29 = vmul.f32 0.020408163, %v635_v25  ;;  %v632_v30 = vpop.xlane.xlu0 %631  ;;  %v2696_v25 = vld [vmem:[%s3336_s10 + $0xd8] sm:$0xff]  ;;  %v2974_v27 = vunpack.c.l.bf16 %v3062_v14 }
 0x110   : > { %v945_v37 = vmul.f32 0.020408163, %v632_v30  ;;  %v1556_v50 = vsel %vm1483_vm10, %v1555_v36, %v1554_v44 }
 0x111   : > { %v1059_v40 = vpack.c.bf16 %v947_v28, %v946_v29  ;;  %v1558_v5 = vsel %vm1487_vm11, %v1557_v45, %v1556_v50  ;;  %v2943_v28 = vunpack.c.h.bf16 %v3054_v15  ;;  %v2942_v29 = vunpack.c.l.bf16 %v3054_v15  ;;  %2208 = vmatpush.bf16.msra.mxu3 %v2696_v25 }
 0x112   : > { %v1058_v42 = vpack.c.bf16 %v945_v37, %v944_v35  ;;  %v2695_v35 = vld [vmem:[%s3336_s10 + $0xd0] sm:$0xff]  ;;  %v849_v38 = vsel %vm494_vm0, %v2974_v27, 0.0 }
 0x113   : > { %844 = vadd.xlane.f32.xlu2 %v843_v26  ;;  %739 = vadd.xlane.f32.xlu1 %v738_v31  ;;  %v1353_v51 = vunpack.c.l.b16 %v1059_v40  ;;  %v1354_v55 = vunpack.c.h.b16 %v1059_v40  ;;  %v804_v39 = vsel %vm494_vm0, %v2943_v28, 0.0  ;;  %v801_v40 = vsel %vm494_vm0, %v2942_v29, 0.0 }
 0x114   : > { %v1351_v53 = vunpack.c.l.b16 %v1058_v42  ;;  %v1352_v54 = vunpack.c.h.b16 %v1058_v42  ;;  %736 = vadd.xlane.f32.xlu0 %v735_v41  ;;  %v3045_v41 = vld [vmem:[%s3341_s26 + $0x150] sm:$0xff]  }
 0x115   : > { %v1563_v6 = vperm.slane %v1353_v51, %v3528_v19  ;;  %v1565_v13 = vperm.slane %v1354_v55, %v3531_v23  ;;  %2209 = vmatpush.bf16.msra.mxu3 %v2695_v35  ;;  %v2907_v51 = vunpack.c.h.bf16 %v3045_v41 }
 0x116   : > { %v1559_v43 = vperm.slane %v1351_v53, %v3512_v57  ;;  %v1561_v63 = vperm.slane %v1352_v54, %v3517_v1  ;;  %v647_v0 = vpop.xlane.xlu2 %646  ;;  %v644_v2 = vpop.xlane.xlu1 %643  ;;  %v2906_v53 = vunpack.c.l.bf16 %v3045_v41  ;;  %v2975_v54 = vunpack.c.h.bf16 %v3062_v14 }
 0x117   : > { %v641_v4 = vpop.xlane.xlu0 %640  ;;  %v949_v16 = vmul.f32 0.020408163, %v644_v2  ;;  %v950_v36 = vmul.f32 0.020408163, %v647_v0 }
 0x118   : > { %v1560_v9 = vsel %vm1491_vm12, %v1559_v43, %v1558_v5  ;;  %v948_v17 = vmul.f32 0.020408163, %v641_v4 }
 0x119   : > { %v1562_v11 = vsel %vm1495_vm13, %v1561_v63, %v1560_v9  ;;  %2210 = vmatpush.bf16.msra.mxu3 %v2694_v49  ;;  %v747_v9 = vsel %vm494_vm0, %v2906_v53, 0.0 }
 0x11a   : > { %v1564_v18 = vsel %vm1499_vm14, %v1563_v6, %v1562_v11  ;;  %v1060_v30 = vpack.c.bf16 %v949_v16, %v948_v17  ;;  %v2693_v6 = vld [vmem:[%s3336_s10 + $0xc0] sm:$0xff] }
 0x11b   : > { %745 = vadd.xlane.f32.xlu2 %v744_v8  ;;  %742 = vadd.xlane.f32.xlu1 %v741_v60  ;;  %v1566_v20 = vsel %vm1503_vm15, %v1565_v13, %v1564_v18  ;;  %v750_v60 = vsel %vm494_vm0, %v2907_v51, 0.0  ;;  %v3063_v11 = vld [vmem:[%s3341_s26 + $0x1e0] sm:$0xff]  }
 0x11c   : > { %847 = vadd.xlane.f32.xlu0 %v846_v10  ;;  %v1737_v26 = vpack.c.b16 %v1566_v20, %v1566_v20  ;;  %v1355_v42 = vunpack.c.l.b16 %v1060_v30  ;;  %v1356_v44 = vunpack.c.h.b16 %v1060_v30  ;;  %v852_v10 = vsel %vm494_vm0, %v2975_v54, 0.0  ;;  %v3055_v13 = vld [vmem:[%s3341_s26 + $0x1a0] sm:$0xff]  }
 0x11d   : > { %2211 = vmatpush.bf16.msra.mxu3 %v2693_v6  ;;  %v2978_v20 = vunpack.c.l.bf16 %v3063_v11  ;;  %v2947_v25 = vunpack.c.h.bf16 %v3055_v13 }
 0x11e   : > { %2199 = vmatmul.bf16.vlgmr.msra.gmra.mxu2 %v1737_v26  ;;  %v656_v31 = vpop.xlane.xlu2 %655  ;;  %v653_v32 = vpop.xlane.xlu1 %652  ;;  %v1567_v55 = vperm.slane %v1355_v42, %v3427_v7  ;;  %v1568_v59 = vperm.slane %v1356_v44, %v3435_v21  ;;  %v2946_v26 = vunpack.c.l.bf16 %v3055_v13  ;;  %v3046_v42 = vld [vmem:[%s3341_s26 + $0x158] sm:$0xff]   ;;  %v3056_v13 = vld [vmem:[%s3341_s26 + $0x1a8] sm:$0xff]  }
 0x11f   : > { %v650_v34 = vpop.xlane.xlu0 %649  ;;  %v953_v47 = vmul.f32 0.020408163, %v656_v31  ;;  %v952_v48 = vmul.f32 0.020408163, %v653_v32  ;;  %v2911_v51 = vunpack.c.h.bf16 %v3046_v42  ;;  %v2910_v53 = vunpack.c.l.bf16 %v3046_v42 }
 0x120   : > { %v951_v37 = vmul.f32 0.020408163, %v650_v34  ;;  %v1569_v14 = vsel %vm1447_vm1, %v1568_v59, %v1567_v55  ;;  %v807_v41 = vsel %vm494_vm0, %v2946_v26, 0.0 }
 0x121   : > { %v1062_v2 = vpack.c.bf16 %v953_v47, %v952_v48 }
 0x122   : > { %v1061_v45 = vpack.c.bf16 %v951_v37, %v950_v36  ;;  %v855_v37 = vsel %vm494_vm0, %v2978_v20, 0.0 }
 0x123   : > { %850 = vadd.xlane.f32.xlu2 %v849_v38  ;;  %805 = vadd.xlane.f32.xlu1 %v804_v39  ;;  %v1359_v17 = vunpack.c.l.b16 %v1062_v2  ;;  %v1360_v31 = vunpack.c.h.b16 %v1062_v2  ;;  %v810_v38 = vsel %vm494_vm0, %v2947_v25, 0.0  ;;  %v2951_v25 = vunpack.c.h.bf16 %v3056_v13 }
 0x124   : > { %v1357_v50 = vunpack.c.l.b16 %v1061_v45  ;;  %802 = vadd.xlane.f32.xlu0 %v801_v40  ;;  %v1358_v43 = vunpack.c.h.b16 %v1061_v45 }
 0x125   : > { %v1574_v32 = vperm.slane %v1359_v17, %v3457_v52  ;;  %v1576_v49 = vperm.slane %v1360_v31, %v3463_v58 }
 0x126   : > { %v665_v63 = vpop.xlane.xlu2 %664  ;;  %v662_v0 = vpop.xlane.xlu1 %661  ;;  %v1570_v4 = vperm.slane %v1357_v50, %v3438_v24  ;;  %v1572_v15 = vperm.slane %v1358_v43, %v3442_v33  ;;  %v2979_v43 = vunpack.c.h.bf16 %v3063_v11 }
 0x127   : > { %v955_v5 = vmul.f32 0.020408163, %v662_v0  ;;  %v659_v62 = vpop.xlane.xlu0 %658  ;;  %v956_v35 = vmul.f32 0.020408163, %v665_v63 }
 0x128   : > { %v954_v8 = vmul.f32 0.020408163, %v659_v62  ;;  %v1571_v18 = vsel %vm1451_vm2, %v1570_v4, %v1569_v14 }
 0x129   : > { %v1573_v27 = vsel %vm1455_vm3, %v1572_v15, %v1571_v18  ;;  %v858_v15 = vsel %vm494_vm0, %v2979_v43, 0.0 }
 0x12a   : > { %v1063_v16 = vpack.c.bf16 %v955_v5, %v954_v8  ;;  %v1575_v39 = vsel %vm1459_vm4, %v1574_v32, %v1573_v27 }
 0x12b   : > { %751 = vadd.xlane.f32.xlu2 %v750_v60  ;;  %748 = vadd.xlane.f32.xlu1 %v747_v9  ;;  %v1577_v54 = vsel %vm1463_vm5, %v1576_v49, %v1575_v39  ;;  %v756_v60 = vsel %vm494_vm0, %v2911_v51, 0.0  ;;  %v753_v9 = vsel %vm494_vm0, %v2910_v53, 0.0 }
 0x12c   : > { %853 = vadd.xlane.f32.xlu0 %v852_v10  ;;  %v1361_v28 = vunpack.c.l.b16 %v1063_v16  ;;  %v1362_v40 = vunpack.c.h.b16 %v1063_v16  ;;  %v3064_v10 = vld [vmem:[%s3341_s26 + $0x1e8] sm:$0xff]  }
 0x12d   : > { %v2982_v20 = vunpack.c.l.bf16 %v3064_v10 }
 0x12e   : > { %v674_v29 = vpop.xlane.xlu2 %673  ;;  %v671_v30 = vpop.xlane.xlu1 %670  ;;  %v1578_v44 = vperm.slane %v1361_v28, %v3467_v61  ;;  %v1580_v55 = vperm.slane %v1362_v40, %v3471_v3 }
 0x12f   : > { %v668_v34 = vpop.xlane.xlu0 %667  ;;  %v959_v45 = vmul.f32 0.020408163, %v674_v29  ;;  %v958_v47 = vmul.f32 0.020408163, %v671_v30  ;;  %v2950_v29 = vunpack.c.l.bf16 %v3056_v13  ;;  %v3065_v13 = vld [vmem:[%s3341_s26 + $0x1f0] sm:$0xff]  }
 0x130   : > { %v957_v36 = vmul.f32 0.020408163, %v668_v34  ;;  %v1579_v63 = vsel %vm1467_vm6, %v1578_v44, %v1577_v54 }
 0x131   : > { %v1065_v0 = vpack.c.bf16 %v959_v45, %v958_v47  ;;  %v1581_v14 = vsel %vm1471_vm7, %v1580_v55, %v1579_v63  ;;  %v813_v45 = vsel %vm494_vm0, %v2950_v29, 0.0 }
 0x132   : > { %v1064_v48 = vpack.c.bf16 %v957_v36, %v956_v35  ;;  %v861_v36 = vsel %vm494_vm0, %v2982_v20, 0.0 }
 0x133   : > { %856 = vadd.xlane.f32.xlu2 %v855_v37  ;;  %811 = vadd.xlane.f32.xlu1 %v810_v38  ;;  %v1365_v16 = vunpack.c.l.b16 %v1065_v0  ;;  %v1366_v27 = vunpack.c.h.b16 %v1065_v0  ;;  %v816_v37 = vsel %vm494_vm0, %v2951_v25, 0.0 }
 0x134   : > { %v1363_v50 = vunpack.c.l.b16 %v1064_v48  ;;  %808 = vadd.xlane.f32.xlu0 %v807_v41  ;;  %v1364_v59 = vunpack.c.h.b16 %v1064_v48  ;;  %v3047_v41 = vld [vmem:[%s3341_s26 + $0x160] sm:$0xff]  }
 0x135   : > { %v1586_v30 = vperm.slane %v1365_v16, %v3501_v46  ;;  %v1588_v44 = vperm.slane %v1366_v27, %v3509_v56  ;;  %v2915_v49 = vunpack.c.h.bf16 %v3047_v41  ;;  %v2914_v54 = vunpack.c.l.bf16 %v3047_v41  ;;  %v2707_v27 = vld [vmem:[%s3336_s10 + $0x130] sm:$0xff] }
 0x136   : > { %v1582_v2 = vperm.slane %v1363_v50, %v3477_v12  ;;  %v683_v4 = vpop.xlane.xlu2 %682  ;;  %v680_v5 = vpop.xlane.xlu1 %679  ;;  %v1584_v11 = vperm.slane %v1364_v59, %v3485_v22  ;;  %v2983_v59 = vunpack.c.h.bf16 %v3064_v10  ;;  %v2986_v16 = vunpack.c.l.bf16 %v3065_v13 }
 0x137   : > { %v961_v62 = vmul.f32 0.020408163, %v680_v5  ;;  %v677_v6 = vpop.xlane.xlu0 %676  ;;  %v962_v38 = vmul.f32 0.020408163, %v683_v4 }
 0x138   : > { %v960_v8 = vmul.f32 0.020408163, %v677_v6  ;;  %v1583_v17 = vsel %vm1475_vm8, %v1582_v2, %v1581_v14  ;;  %v759_v6 = vsel %vm494_vm0, %v2914_v54, 0.0  ;;  %v3057_v14 = vld [vmem:[%s3341_s26 + $0x1b0] sm:$0xff]   ;;  %v3772_v54 = vld [vmem:[%s3341_s26 + $0x1f8] sm:$0xff]  }
 0x139   : > { %v1585_v28 = vsel %vm1479_vm9, %v1584_v11, %v1583_v17  ;;  %v2955_v17 = vunpack.c.h.bf16 %v3057_v14 }
 0x13a   : > { %v1066_v18 = vpack.c.bf16 %v961_v62, %v960_v8  ;;  %v1587_v42 = vsel %vm1483_vm10, %v1586_v30, %v1585_v28  ;;  %v762_v62 = vsel %vm494_vm0, %v2915_v49, 0.0  ;;  %v867_v28 = vsel %vm494_vm0, %v2986_v16, 0.0 }
 0x13b   : > { %757 = vadd.xlane.f32.xlu2 %v756_v60  ;;  %754 = vadd.xlane.f32.xlu1 %v753_v9  ;;  %v1589_v50 = vsel %vm1487_vm11, %v1588_v44, %v1587_v42  ;;  %v864_v9 = vsel %vm494_vm0, %v2983_v59, 0.0  ;;  %v822_v29 = vsel %vm494_vm0, %v2955_v17, 0.0 }
 0x13c   : > { %v1367_v26 = vunpack.c.l.b16 %v1066_v18  ;;  %859 = vadd.xlane.f32.xlu0 %v858_v15  ;;  %v1368_v34 = vunpack.c.h.b16 %v1066_v18  ;;  %v2708_v15 = vld [vmem:[%s3336_s10 + $0x138] sm:$0xff]  ;;  %v2954_v18 = vunpack.c.l.bf16 %v3057_v14 }
 0x13d   : > { %2217 = vmatpush.bf16.msrb.mxu0 %v2708_v15 }
 0x13e   : > { %v3720_v31 = vpop.xlane.xlu2 %691  ;;  %v3722_v32 = vpop.xlane.xlu1 %688  ;;  %v1590_v39 = vperm.slane %v1367_v26, %v3512_v57  ;;  %v1592_v48 = vperm.slane %v1368_v34, %v3517_v1  ;;  %v819_v34 = vsel %vm494_vm0, %v2954_v18, 0.0 }
 0x13f   : > { %v686_v35 = vpop.xlane.xlu0 %685  ;;  %v965_v42 = vmul.f32 0.020408163, %v3720_v31  ;;  %v964_v44 = vmul.f32 0.020408163, %v3722_v32  ;;  %v2704_v31 = vld [vmem:[%s3336_s10 + $0x118] sm:$0xff]  ;;  %v2990_v32 = vunpack.c.l.bf16 %v3772_v54 }
 0x140   : > { %v963_v40 = vmul.f32 0.020408163, %v686_v35  ;;  %v1591_v55 = vsel %vm1491_vm12, %v1590_v39, %v1589_v50  ;;  %v3048_v35 = vld [vmem:[%s3341_s26 + $0x168] sm:$0xff]   ;;  %v2987_v39 = vunpack.c.h.bf16 %v3065_v13 }
 0x141   : > { %v1593_v5 = vsel %vm1495_vm13, %v1592_v48, %v1591_v55  ;;  %2218 = vmatpush.bf16.msrb.mxu0 %v2707_v27  ;;  %v3058_v55 = vld [vmem:[%s3341_s26 + $0x1b8] sm:$0xff]   ;;  %v1068_v59 = vpack.c.bf16 %v965_v42, %v964_v44  ;;  %v873_v15 = vsel %vm494_vm0, %v2990_v32, 0.0 }
 0x142   : > { %v1067_v47 = vpack.c.bf16 %v963_v40, %v962_v38  ;;  %v2918_v38 = vunpack.c.l.bf16 %v3048_v35  ;;  %v870_v50 = vsel %vm494_vm0, %v2987_v39, 0.0  ;;  %v2991_v39 = vunpack.c.h.bf16 %v3772_v54 }
 0x143   : > { %862 = vadd.xlane.f32.xlu2 %v861_v36  ;;  %817 = vadd.xlane.f32.xlu1 %v816_v37  ;;  %v2706_v36 = vld [vmem:[%s3336_s10 + $0x128] sm:$0xff]  ;;  %v2919_v37 = vunpack.c.h.bf16 %v3048_v35 }
 0x144   : > { %v1369_v51 = vunpack.c.l.b16 %v1067_v47  ;;  %v1370_v53 = vunpack.c.h.b16 %v1067_v47  ;;  %814 = vadd.xlane.f32.xlu0 %v813_v45  ;;  %v2705_v47 = vld [vmem:[%s3336_s10 + $0x120] sm:$0xff]  ;;  %v765_v49 = vsel %vm494_vm0, %v2918_v38, 0.0 }
 0x145   : > { %2219 = vmatpush.bf16.msrb.mxu0 %v2706_v36  ;;  %v768_v48 = vsel %vm494_vm0, %v2919_v37, 0.0 }
 0x146   : > { %v1594_v43 = vperm.slane %v1369_v51, %v3528_v19  ;;  %v3735_v63 = vpop.xlane.xlu2 %700  ;;  %v698_v0 = vpop.xlane.xlu1 %697  ;;  %v1596_v2 = vperm.slane %v1370_v53, %v3531_v23 }
 0x147   : > { %v695_v4 = vpop.xlane.xlu0 %694  ;;  %v967_v51 = vmul.f32 0.020408163, %v698_v0  ;;  %v968_v0 = vmul.f32 0.020408163, %v3735_v63 }
 0x148   : > { %v1595_v8 = vsel %vm1499_vm14, %v1594_v43, %v1593_v5  ;;  %v966_v53 = vmul.f32 0.020408163, %v695_v4  ;;  %v2959_v43 = vunpack.c.h.bf16 %v3058_v55 }
 0x149   : > { %v3742_v60 = vpop.f32.mrf.mxu0  ;;  %v1597_v10 = vsel %vm1503_vm15, %v1596_v2, %v1595_v8  ;;  %2220 = vmatpush.bf16.msrb.mxu0 %v2705_v47  ;;  %v1371_v8 = vunpack.c.l.b16 %v1068_v59 }
 0x14a   : > { %v1738_v11 = vpack.c.b16 %v1597_v10, %v1597_v10  ;;  %v1069_v2 = vpack.c.bf16 %v967_v51, %v966_v53  ;;  %v828_v16 = vsel %vm494_vm0, %v2959_v43, 0.0 }
 0x14b   : > { %763 = vadd.xlane.f32.xlu2 %v762_v62  ;;  %760 = vadd.xlane.f32.xlu1 %v759_v6  ;;  %v2958_v62 = vunpack.c.l.bf16 %v3058_v55  ;;  %v1598_v63 = vperm.slane %v1371_v8, %v3427_v7 }
 0x14c   : > { %865 = vadd.xlane.f32.xlu0 %v864_v9  ;;  %2212 = vmatmul.bf16.vlgmr.msra.gmra.mxu3 %v1738_v11  ;;  %v1372_v9 = vunpack.c.h.b16 %v1068_v59  ;;  %v2703_v11 = vld [vmem:[%s3336_s10 + $0x110] sm:$0xff]  ;;  %v1373_v17 = vunpack.c.l.b16 %v1069_v2  ;;  %v2701_v59 = vld [vmem:[%s3336_s10 + $0x100] sm:$0xff] }
 0x14d   : > { %2221 = vmatpush.bf16.msrb.mxu0 %v2704_v31  ;;  %v825_v27 = vsel %vm494_vm0, %v2958_v62, 0.0 }
 0x14e   : > { %v3749_v20 = vpop.xlane.xlu2 %709  ;;  %v3751_v25 = vpop.xlane.xlu1 %706  ;;  %v1601_v37 = vperm.slane %v1373_v17, %v3438_v24 }
 0x14f   : > { %v704_v26 = vpop.xlane.xlu0 %703  ;;  %v971_v42 = vmul.f32 0.020408163, %v3749_v20  ;;  %v970_v44 = vmul.f32 0.020408163, %v3751_v25  ;;  %v3067_v20 = vld [vmem:[%s3341_s26 + $0x200] sm:$0xff]  }
 0x150   : > { %v969_v5 = vmul.f32 0.020408163, %v704_v26 }
 0x151   : > { %v2176_v30 = vpop.f32.mrf.mxu0  ;;  %2222 = vmatpush.bf16.msrb.mxu0 %v2703_v11 }
 0x152   : > { %v1070_v18 = vpack.c.bf16 %v969_v5, %v968_v0  ;;  %v2702_v30 = vld [vmem:[%s3336_s10 + $0x108] sm:$0xff]  ;;  %v876_v0 = vsel %vm494_vm0, %v2991_v39, 0.0 }
 0x153   : > { %868 = vadd.xlane.f32.xlu2 %v867_v28  ;;  %823 = vadd.xlane.f32.xlu1 %v822_v29  ;;  %v3049_v28 = vld [vmem:[%s3341_s26 + $0x170] sm:$0xff]   ;;  %v1599_v29 = vperm.slane %v1372_v9, %v3435_v21 }
 0x154   : > { %820 = vadd.xlane.f32.xlu0 %v819_v34  ;;  %v1374_v34 = vunpack.c.h.b16 %v1069_v2  ;;  %v2923_v35 = vunpack.c.h.bf16 %v3049_v28  ;;  %v2922_v36 = vunpack.c.l.bf16 %v3049_v28  ;;  %v1375_v38 = vunpack.c.l.b16 %v1070_v18  ;;  %v3796_v2 = vld [vmem:[%s3341_s26 + $0x178] sm:$0xff]  }
 0x155   : > { %2223 = vmatpush.bf16.msrb.mxu0 %v2702_v30  ;;  %v1376_v5 = vunpack.c.h.b16 %v1070_v18  ;;  %v2926_v11 = vunpack.c.l.bf16 %v3796_v2 }
 0x156   : > { %v3759_v40 = vpop.xlane.xlu2 %718  ;;  %v3761_v41 = vpop.xlane.xlu1 %715  ;;  %v1603_v31 = vperm.slane %v1374_v34, %v3442_v33  ;;  %v774_v54 = vsel %vm494_vm0, %v2923_v35, 0.0  ;;  %v771_v43 = vsel %vm494_vm0, %v2922_v36, 0.0  ;;  %v1605_v62 = vperm.slane %v1375_v38, %v3457_v52 }
 0x157   : > { %v3765_v45 = vpop.xlane.xlu0 %712  ;;  %v777_v38 = vsel %vm494_vm0, %v2926_v11, 0.0 }
 0x158   : > { %v972_v8 = vmul.f32 0.020408163, %v3765_v45  ;;  %v2994_v45 = vunpack.c.l.bf16 %v3067_v20 }
 0x159   : > { %2224 = vmatpush.bf16.msrb.mxu0 %v2701_v59  ;;  %v3068_v59 = vld [vmem:[%s3341_s26 + $0x208] sm:$0xff]  }
 0x15b   : > { %769 = vadd.xlane.f32.xlu2 %v768_v48  ;;  %766 = vadd.xlane.f32.xlu1 %v765_v49  ;;  %v1600_v49 = vsel %vm1447_vm1, %v1599_v29, %v1598_v63 }
 0x15c   : > { %871 = vadd.xlane.f32.xlu0 %v870_v50  ;;  %v1602_v25 = vsel %vm1451_vm2, %v1601_v37, %v1600_v49 }
 0x15e   : > { %v788_v4 = vpop.xlane.xlu2 %787  ;;  %v785_v6 = vpop.xlane.xlu1 %784 }
 0x15f   : > { %v997_v10 = vmul.f32 0.020408163, %v788_v4  ;;  %v996_v13 = vmul.f32 0.020408163, %v785_v6  ;;  %v722_v14 = vpop.xlane.xlu0 %721  ;;  %v1071_v4 = vpack.c.bf16 %v971_v42, %v970_v44  ;;  %v973_v6 = vmul.f32 0.020408163, %v3761_v41 }
 0x160   : > { %v1607_v41 = vperm.slane %v1376_v5, %v3463_v58  ;;  %v975_v28 = vmul.f32 0.020408163, %v722_v14  ;;  %v974_v42 = vmul.f32 0.020408163, %v3759_v40  ;;  %v2998_v5 = vunpack.c.l.bf16 %v3068_v59 }
 0x161   : > { %v1084_v26 = vpack.c.bf16 %v997_v10, %v996_v13  ;;  %v1377_v35 = vunpack.c.l.b16 %v1071_v4  ;;  %v1378_v49 = vunpack.c.h.b16 %v1071_v4  ;;  %v2927_v4 = vunpack.c.h.bf16 %v3796_v2 }
 0x162   : > { %v885_v2 = vsel %vm494_vm0, %v2998_v5, 0.0 }
 0x163   : > { %874 = vadd.xlane.f32.xlu2 %v873_v15  ;;  %829 = vadd.xlane.f32.xlu1 %v828_v16  ;;  %v1403_v50 = vunpack.c.l.b16 %v1084_v26  ;;  %v1404_v51 = vunpack.c.h.b16 %v1084_v26  ;;  %v2995_v15 = vunpack.c.h.bf16 %v3067_v20  ;;  %v1604_v16 = vsel %vm1455_vm3, %v1603_v31, %v1602_v25 }
 0x164   : > { %826 = vadd.xlane.f32.xlu0 %v825_v27  ;;  %v1606_v26 = vsel %vm1459_vm4, %v1605_v62, %v1604_v16  ;;  %v1072_v27 = vpack.c.bf16 %v973_v6, %v972_v8  ;;  %v1609_v40 = vperm.slane %v1377_v35, %v3467_v61  ;;  %v2999_v25 = vunpack.c.h.bf16 %v3068_v59 }
 0x165   : > { %v1660_v10 = vperm.slane %v1403_v50, %v3427_v7  ;;  %v1661_v13 = vperm.slane %v1404_v51, %v3435_v21  ;;  %v882_v39 = vsel %vm494_vm0, %v2995_v15, 0.0  ;;  %v1608_v50 = vsel %vm1463_vm5, %v1607_v41, %v1606_v26 }
 0x166   : > { %v833_v47 = vpop.xlane.xlu2 %832  ;;  %v794_v48 = vpop.xlane.xlu1 %793  ;;  %v1379_v31 = vunpack.c.l.b16 %v1072_v27  ;;  %v1610_v62 = vsel %vm1467_vm6, %v1609_v40, %v1608_v50  ;;  %v1611_v6 = vperm.slane %v1378_v49, %v3471_v3 }
 0x167   : > { %v999_v53 = vmul.f32 0.020408163, %v794_v48  ;;  %v791_v55 = vpop.xlane.xlu0 %790  ;;  %v1662_v36 = vsel %vm1447_vm1, %v1661_v13, %v1660_v10  ;;  %v1012_v44 = vmul.f32 0.020408163, %v833_v47  ;;  %v3069_v13 = vld [vmem:[%s3341_s26 + $0x210] sm:$0xff]  }
 0x168   : > { %v998_v32 = vmul.f32 0.020408163, %v791_v55  ;;  %v879_v55 = vsel %vm494_vm0, %v2994_v45, 0.0  ;;  %v1612_v26 = vsel %vm1471_vm7, %v1611_v6, %v1610_v62  ;;  %v888_v45 = vsel %vm494_vm0, %v2999_v25, 0.0 }
 0x16a   : > { %v1085_v9 = vpack.c.bf16 %v999_v53, %v998_v32  ;;  %v1073_v32 = vpack.c.bf16 %v975_v28, %v974_v42 }
 0x16b   : > { %775 = vadd.xlane.f32.xlu2 %v774_v54  ;;  %772 = vadd.xlane.f32.xlu1 %v771_v43 }
 0x16c   : > { %v1405_v17 = vunpack.c.l.b16 %v1085_v9  ;;  %v1406_v18 = vunpack.c.h.b16 %v1085_v9  ;;  %877 = vadd.xlane.f32.xlu0 %v876_v0  ;;  %v1380_v0 = vunpack.c.h.b16 %v1072_v27  ;;  %v1381_v8 = vunpack.c.l.b16 %v1073_v32 }
 0x16d   : > { %v1382_v28 = vunpack.c.h.b16 %v1073_v32 }
 0x16e   : > { %v1663_v63 = vperm.slane %v1405_v17, %v3438_v24  ;;  %v1665_v29 = vperm.slane %v1406_v18, %v3442_v33  ;;  %v728_v30 = vpop.xlane.xlu2 %727  ;;  %v725_v34 = vpop.xlane.xlu1 %724  ;;  %v1615_v27 = vperm.slane %v1380_v0, %v3485_v22 }
 0x16f   : > { %v836_v37 = vpop.xlane.xlu0 %835  ;;  %v977_v47 = vmul.f32 0.020408163, %v728_v30  ;;  %v976_v20 = vmul.f32 0.020408163, %v725_v34  ;;  %v3003_v30 = vunpack.c.h.bf16 %v3069_v13  ;;  %v358_v34 = vld [vmem:[%s3341_s26 + $0x218] sm:$0xf]  ;;  %v1619_v50 = vperm.slane %v1382_v28, %v3509_v56 }
 0x170   : > { %v1664_v14 = vsel %vm1451_vm2, %v1663_v63, %v1662_v36  ;;  %v1013_v48 = vmul.f32 0.020408163, %v836_v37  ;;  %v1617_v36 = vperm.slane %v1381_v8, %v3501_v46 }
 0x171   : > { %v3819_v51 = vsel %vm1455_vm3, %v1665_v29, %v1664_v14  ;;  %v2187_v53 = vpop.f32.mrf.mxu1  ;;  %v1074_v11 = vpack.c.bf16 %v977_v47, %v976_v20  ;;  %v780_v29 = vsel %vm494_vm0, %v2927_v4, 0.0 }
 0x172   : > { %v1092_v54 = vpack.c.bf16 %v1013_v48, %v1012_v44  ;;  %v3824_v43 = vadd.f32 %v2187_v53, %v3742_v60  ;;  %v1613_v60 = vperm.slane %v1379_v31, %v3477_v12  ;;  %v493_v48 = vunpack.c.l.bf16 %v358_v34 }
 0x173   : > { %778 = vadd.xlane.f32.xlu2 %v777_v38  ;;  %883 = vadd.xlane.f32.xlu1 %v882_v39  ;;  %v1383_v38 = vunpack.c.l.b16 %v1074_v11  ;;  %v894_v53 = vsel %vm494_vm0, %v3003_v30, 0.0  ;;  %v1384_v31 = vunpack.c.h.b16 %v1074_v11 }
 0x174   : > { %880 = vadd.xlane.f32.xlu0 %v879_v55  ;;  %v1419_v15 = vunpack.c.l.b16 %v1092_v54  ;;  %v1420_v16 = vunpack.c.h.b16 %v1092_v54  ;;  %v1614_v35 = vsel %vm1475_vm8, %v1613_v60, %v1612_v26  ;;  %v3002_v55 = vunpack.c.l.bf16 %v3069_v13 }
 0x175   : > { %v1616_v49 = vsel %vm1479_vm9, %v1615_v27, %v1614_v35  ;;  %v1621_v20 = vperm.slane %v1383_v38, %v3512_v57  ;;  %v897_v8 = vsel %vm494_vm0, %v493_v48, 0.0 }
 0x176   : > { %v797_v9 = vpop.xlane.xlu2 %796  ;;  %v842_v10 = vpop.xlane.xlu1 %841  ;;  %v1691_v39 = vperm.slane %v1419_v15, %v3427_v7  ;;  %v1692_v42 = vperm.slane %v1420_v16, %v3435_v21  ;;  %v1618_v59 = vsel %vm1483_vm10, %v1617_v36, %v1616_v49  ;;  %v891_v11 = vsel %vm494_vm0, %v3002_v55, 0.0 }
 0x177   : > { %v1015_v17 = vmul.f32 0.020408163, %v842_v10  ;;  %v839_v18 = vpop.xlane.xlu0 %838  ;;  %v1000_v4 = vmul.f32 0.020408163, %v797_v9  ;;  %v1620_v15 = vsel %vm1487_vm11, %v1619_v50, %v1618_v59  ;;  %v1623_v16 = vperm.slane %v1384_v31, %v3517_v1 }
 0x178   : > { %v1014_v41 = vmul.f32 0.020408163, %v839_v18  ;;  %v1693_v25 = vsel %vm1447_vm1, %v1692_v42, %v1691_v39  ;;  %v1622_v9 = vsel %vm1491_vm12, %v1621_v20, %v1620_v15  ;;  %vm2161_vm0 = vcmask 1043456  }
 0x179   : > { %v2189_v63 = vpop.f32.mrf.mxu1  ;;  %v1624_v34 = vsel %vm1495_vm13, %v1623_v16, %v1622_v9 }
 0x17a   : > { %v1093_v37 = vpack.c.bf16 %v1015_v17, %v1014_v41 }
 0x17b   : > { %889 = vadd.xlane.f32.xlu2 %v888_v45  ;;  %886 = vadd.xlane.f32.xlu1 %v885_v2 }
 0x17c   : > { %v1421_v44 = vunpack.c.l.b16 %v1093_v37  ;;  %v1422_v14 = vunpack.c.h.b16 %v1093_v37  ;;  %781 = vadd.xlane.f32.xlu0 %v780_v29 }
 0x17e   : > { %v1694_v32 = vperm.slane %v1421_v44, %v3438_v24  ;;  %v1696_v54 = vperm.slane %v1422_v14, %v3442_v33  ;;  %v734_v40 = vpop.xlane.xlu2 %733  ;;  %v731_v47 = vpop.xlane.xlu1 %730 }
 0x17f   : > { %v979_v5 = vmul.f32 0.020408163, %v734_v40  ;;  %v978_v62 = vmul.f32 0.020408163, %v731_v47  ;;  %v800_v0 = vpop.xlane.xlu0 %799 }
 0x180   : > { %v1695_v6 = vsel %vm1451_vm2, %v1694_v32, %v1693_v25  ;;  %v1001_v60 = vmul.f32 0.020408163, %v800_v0 }
 0x181   : > { %v1697_v10 = vsel %vm1455_vm3, %v1696_v54, %v1695_v6  ;;  %v1075_v13 = vpack.c.bf16 %v979_v5, %v978_v62 }
 0x182   : > { %v1086_v17 = vpack.c.bf16 %v1001_v60, %v1000_v4 }
 0x183   : > { %v1385_v18 = vunpack.c.l.b16 %v1075_v13  ;;  %v1386_v26 = vunpack.c.h.b16 %v1075_v13  ;;  %895 = vadd.xlane.f32.xlu1 %v894_v53  ;;  %898 = vadd.xlane.f32.xlu2 %v897_v8 }
 0x184   : > { %v1407_v41 = vunpack.c.l.b16 %v1086_v17  ;;  %v1408_v45 = vunpack.c.h.b16 %v1086_v17  ;;  %892 = vadd.xlane.f32.xlu0 %v891_v11 }
 0x185   : > { %v1625_v2 = vperm.slane %v1385_v18, %v3528_v19  ;;  %v1627_v27 = vperm.slane %v1386_v26, %v3531_v23 }
 0x186   : > { %v1667_v28 = vperm.slane %v1407_v41, %v3457_v52  ;;  %v1669_v63 = vperm.slane %v1408_v45, %v3463_v58  ;;  %v845_v29 = vpop.xlane.xlu2 %844  ;;  %v740_v30 = vpop.xlane.xlu1 %739 }
 0x187   : > { %v981_v35 = vmul.f32 0.020408163, %v740_v30  ;;  %v737_v36 = vpop.xlane.xlu0 %736  ;;  %v1626_v37 = vsel %vm1499_vm14, %v1625_v2, %v1624_v34  ;;  %v1016_v54 = vmul.f32 0.020408163, %v845_v29 }
 0x188   : > { %v1668_v38 = vsel %vm1459_vm4, %v1667_v28, %v3819_v51  ;;  %v980_v39 = vmul.f32 0.020408163, %v737_v36  ;;  %v1628_v42 = vsel %vm1503_vm15, %v1627_v27, %v1626_v37  ;;  %v2724_v37 = vld [vmem:[%s3336_s10 + $0x1b8] sm:$0xff] }
 0x189   : > { %v3867_v44 = vsel %vm1463_vm5, %v1669_v63, %v1668_v38  ;;  %v1739_v14 = vpack.c.b16 %v1628_v42, %v1628_v42  ;;  %2243 = vmatpush.bf16.msrb.mxu2 %v2724_v37 }
 0x18a   : > { %v1076_v48 = vpack.c.bf16 %v981_v35, %v980_v39 }
 0x18b   : > { %2225 = vmatmul.bf16.vlgmr.msrb.gmra.mxu0 %v1739_v14 }
 0x18c   : > { %v1387_v49 = vunpack.c.l.b16 %v1076_v48  ;;  %v1388_v50 = vunpack.c.h.b16 %v1076_v48 }
 0x18e   : > { %v746_v53 = vpop.xlane.xlu2 %745  ;;  %v743_v55 = vpop.xlane.xlu1 %742  ;;  %v1629_v51 = vperm.slane %v1387_v49, %v3427_v7  ;;  %v1630_v20 = vperm.slane %v1388_v50, %v3435_v21 }
 0x18f   : > { %v983_v59 = vmul.f32 0.020408163, %v746_v53  ;;  %v982_v31 = vmul.f32 0.020408163, %v743_v55  ;;  %v848_v32 = vpop.xlane.xlu0 %847  ;;  %v2722_v53 = vld [vmem:[%s3336_s10 + $0x1a8] sm:$0xff]  ;;  %v2732_v55 = vld [vmem:[%s3336_s10 + $0x1f8] sm:$0xff] }
 0x190   : > { %v1017_v40 = vmul.f32 0.020408163, %v848_v32  ;;  %v1631_v8 = vsel %vm1447_vm1, %v1630_v20, %v1629_v51  ;;  %2256 = vmatpush.bf16.msrb.mxu3 %v2732_v55  ;;  %v2730_v51 = vld [vmem:[%s3336_s10 + $0x1e8] sm:$0xff] }
 0x191   : > { %v1077_v47 = vpack.c.bf16 %v983_v59, %v982_v31 }
 0x192   : > { %v1094_v25 = vpack.c.bf16 %v1017_v40, %v1016_v54  ;;  %v2721_v54 = vld [vmem:[%s3336_s10 + $0x1a0] sm:$0xff]  ;;  %v2731_v40 = vld [vmem:[%s3336_s10 + $0x1f0] sm:$0xff] }
 0x193   : > { %v1389_v5 = vunpack.c.l.b16 %v1077_v47  ;;  %v1390_v62 = vunpack.c.h.b16 %v1077_v47  ;;  %v2720_v47 = vld [vmem:[%s3336_s10 + $0x198] sm:$0xff] }
 0x194   : > { %v1423_v0 = vunpack.c.l.b16 %v1094_v25  ;;  %v1424_v4 = vunpack.c.h.b16 %v1094_v25  ;;  %2257 = vmatpush.bf16.msrb.mxu3 %v2731_v40 }
 0x195   : > { %v1632_v6 = vperm.slane %v1389_v5, %v3438_v24  ;;  %v1634_v60 = vperm.slane %v1390_v62, %v3442_v33  ;;  %v2719_v62 = vld [vmem:[%s3336_s10 + $0x190] sm:$0xff] }
 0x196   : > { %v1698_v13 = vperm.slane %v1423_v0, %v3457_v52  ;;  %v1700_v11 = vperm.slane %v1424_v4, %v3463_v58  ;;  %v3876_v15 = vpop.xlane.xlu2 %850  ;;  %v806_v16 = vpop.xlane.xlu1 %805  ;;  %v2729_v0 = vld [vmem:[%s3336_s10 + $0x1e0] sm:$0xff]  ;;  %v2716_v4 = vld [vmem:[%s3336_s10 + $0x178] sm:$0xff] }
 0x197   : > { %v1633_v17 = vsel %vm1451_vm2, %v1632_v6, %v1631_v8  ;;  %v803_v18 = vpop.xlane.xlu0 %802  ;;  %v2718_v6 = vld [vmem:[%s3336_s10 + $0x188] sm:$0xff]  ;;  %v1003_v8 = vmul.f32 0.020408163, %v806_v16  ;;  %2230 = vmatpush.bf16.msrb.mxu1 %v2716_v4 }
 0x198   : > { %v1635_v26 = vsel %vm1455_vm3, %v1634_v60, %v1633_v17  ;;  %v1699_v9 = vsel %vm1459_vm4, %v1698_v13, %v1697_v10  ;;  %2258 = vmatpush.bf16.msrb.mxu3 %v2730_v51  ;;  %v2728_v60 = vld [vmem:[%s3336_s10 + $0x1d8] sm:$0xff]  ;;  %v1002_v13 = vmul.f32 0.020408163, %v803_v18 }
 0x199   : > { %v3882_v41 = vsel %vm1463_vm5, %v1700_v11, %v1699_v9  ;;  %v2715_v9 = vld [vmem:[%s3336_s10 + $0x170] sm:$0xff] }
 0x19b   : > { %2231 = vmatpush.bf16.msrb.mxu1 %v2715_v9 }
 0x19c   : > { %2259 = vmatpush.bf16.msrb.mxu3 %v2729_v0 }
 0x19e   : > { %v752_v45 = vpop.xlane.xlu2 %751  ;;  %v749_v2 = vpop.xlane.xlu1 %748 }
 0x19f   : > { %v985_v27 = vmul.f32 0.020408163, %v752_v45  ;;  %v984_v28 = vmul.f32 0.020408163, %v749_v2  ;;  %v854_v63 = vpop.xlane.xlu0 %853  ;;  %v2717_v45 = vld [vmem:[%s3336_s10 + $0x180] sm:$0xff]  ;;  %v2727_v2 = vld [vmem:[%s3336_s10 + $0x1d0] sm:$0xff] }
 0x1a0   : > { %2260 = vmatpush.bf16.msrb.mxu3 %v2728_v60 }
 0x1a1   : > { %v1078_v29 = vpack.c.bf16 %v985_v27, %v984_v28  ;;  %v2200_v30 = vpop.f32.mrf.mxu2  ;;  %v1087_v27 = vpack.c.bf16 %v1003_v8, %v1002_v13  ;;  %v1019_v28 = vmul.f32 0.020408163, %v854_v63  ;;  %v2725_v63 = vld [vmem:[%s3336_s10 + $0x1c0] sm:$0xff] }
 0x1a2   : > { %v3885_v34 = vadd.f32 %v2200_v30, %v3824_v43  ;;  %v2723_v43 = vld [vmem:[%s3336_s10 + $0x1b0] sm:$0xff]  ;;  %v2726_v30 = vld [vmem:[%s3336_s10 + $0x1c8] sm:$0xff] }
 0x1a3   : > { %v1391_v35 = vunpack.c.l.b16 %v1078_v29  ;;  %v1392_v36 = vunpack.c.h.b16 %v1078_v29  ;;  %2244 = vmatpush.bf16.msrb.mxu2 %v2723_v43  ;;  %v2714_v29 = vld [vmem:[%s3336_s10 + $0x168] sm:$0xff] }
 0x1a4   : > { %2261 = vmatpush.bf16.msrb.mxu3 %v2727_v2  ;;  %2232 = vmatpush.bf16.msrb.mxu1 %v2714_v29 }
 0x1a5   : > { %v1636_v10 = vperm.slane %v1391_v35, %v3457_v52  ;;  %v1638_v38 = vperm.slane %v1392_v36, %v3463_v58  ;;  %v1018_v35 = vmul.f32 0.020408163, %v3876_v15  ;;  %v1409_v36 = vunpack.c.l.b16 %v1087_v27 }
 0x1a6   : > { %v3890_v39 = vpop.xlane.xlu2 %856  ;;  %v812_v42 = vpop.xlane.xlu1 %811 }
 0x1a7   : > { %v1637_v14 = vsel %vm1459_vm4, %v1636_v10, %v1635_v26  ;;  %v809_v48 = vpop.xlane.xlu0 %808  ;;  %2245 = vmatpush.bf16.msrb.mxu2 %v2722_v53  ;;  %v1005_v16 = vmul.f32 0.020408163, %v812_v42  ;;  %v1095_v37 = vpack.c.bf16 %v1019_v28, %v1018_v35  ;;  %v1410_v42 = vunpack.c.h.b16 %v1087_v27  ;;  %v2711_v28 = vld [vmem:[%s3336_s10 + $0x150] sm:$0xff] }
 0x1a8   : > { %v3895_v49 = vsel %vm1463_vm5, %v1638_v38, %v1637_v14  ;;  %v1004_v18 = vmul.f32 0.020408163, %v809_v48  ;;  %2262 = vmatpush.bf16.msrb.mxu3 %v2726_v30  ;;  %v1671_v48 = vperm.slane %v1409_v36, %v3467_v61  ;;  %v1020_v51 = vmul.f32 0.020408163, %v3890_v39  ;;  %v1238_v30 = vld [vmem:[%s3336_s10 + $0x218] sm:$0xf] }
 0x1a9   : > { %v2202_v50 = vpop.f32.mrf.mxu2  ;;  %v2021_v35 = vunpack.c.l.b16 %v1238_v30 }
 0x1aa   : > { %v1088_v14 = vpack.c.bf16 %v1005_v16, %v1004_v18  ;;  %v2713_v50 = vld [vmem:[%s3336_s10 + $0x160] sm:$0xff] }
 0x1ab   : > { %2246 = vmatpush.bf16.msrb.mxu2 %v2721_v54  ;;  %2233 = vmatpush.bf16.msrb.mxu1 %v2713_v50  ;;  %v1425_v54 = vunpack.c.l.b16 %v1095_v37 }
 0x1ac   : > { %2263 = vmatpush.bf16.msrb.mxu3 %v2725_v63  ;;  %v1411_v40 = vunpack.c.l.b16 %v1088_v14  ;;  %v1412_v39 = vunpack.c.h.b16 %v1088_v14  ;;  %v2710_v63 = vld [vmem:[%s3336_s10 + $0x148] sm:$0xff] }
 0x1ad   : > { %v1702_v60 = vperm.slane %v1425_v54, %v3467_v61 }
 0x1ae   : > { %v3899_v59 = vpop.xlane.xlu2 %757  ;;  %v3901_v31 = vpop.xlane.xlu1 %754 }
 0x1af   : > { %v860_v32 = vpop.xlane.xlu0 %859  ;;  %2247 = vmatpush.bf16.msrb.mxu2 %v2720_v47  ;;  %v2712_v47 = vld [vmem:[%s3336_s10 + $0x158] sm:$0xff]  ;;  %v1703_v36 = vsel %vm1467_vm6, %v1702_v60, %v3882_v41  ;;  %v986_v41 = vmul.f32 0.020408163, %v3901_v31 }
 0x1b0   : > { %v1021_v15 = vmul.f32 0.020408163, %v860_v32  ;;  %2234 = vmatpush.bf16.msrb.mxu1 %v2712_v47 }
 0x1b2   : > { %v1096_v32 = vpack.c.bf16 %v1021_v15, %v1020_v51 }
 0x1b3   : > { %2248 = vmatpush.bf16.msrb.mxu2 %v2719_v62 }
 0x1b4   : > { %2235 = vmatpush.bf16.msrb.mxu1 %v2711_v28  ;;  %v1428_v54 = vunpack.c.h.b16 %v1096_v32 }
 0x1b6   : > { %v3907_v20 = vpop.xlane.xlu2 %862  ;;  %v818_v25 = vpop.xlane.xlu1 %817  ;;  %v1708_v28 = vperm.slane %v1428_v54, %v3485_v22 }
 0x1b7   : > { %v815_v5 = vpop.xlane.xlu0 %814  ;;  %2249 = vmatpush.bf16.msrb.mxu2 %v2718_v6  ;;  %v1007_v53 = vmul.f32 0.020408163, %v818_v25  ;;  %v1672_v6 = vsel %vm1467_vm6, %v1671_v48, %v3867_v44  ;;  %v1673_v25 = vperm.slane %v1410_v42, %v3471_v3  ;;  %v1022_v44 = vmul.f32 0.020408163, %v3907_v20 }
 0x1b8   : > { %v1006_v55 = vmul.f32 0.020408163, %v815_v5  ;;  %v1426_v5 = vunpack.c.h.b16 %v1095_v37  ;;  %v1677_v20 = vperm.slane %v1412_v39, %v3485_v22  ;;  %v987_v48 = vmul.f32 0.020408163, %v3899_v59  ;;  %2236 = vmatpush.bf16.msrb.mxu1 %v2710_v63 }
 0x1ba   : > { %v1089_v62 = vpack.c.bf16 %v1007_v53, %v1006_v55  ;;  %v1704_v37 = vperm.slane %v1426_v5, %v3471_v3 }
 0x1bb   : > { %2250 = vmatpush.bf16.msrb.mxu2 %v2717_v45  ;;  %v1675_v45 = vperm.slane %v1411_v40, %v3477_v12 }
 0x1bc   : > { %v1413_v16 = vunpack.c.l.b16 %v1089_v62  ;;  %v1414_v50 = vunpack.c.h.b16 %v1089_v62  ;;  %v1705_v40 = vsel %vm1471_vm7, %v1704_v37, %v1703_v36 }
 0x1be   : > { %v3914_v11 = vpop.xlane.xlu2 %763  ;;  %v3916_v17 = vpop.xlane.xlu1 %760  ;;  %v1679_v53 = vperm.slane %v1413_v16, %v3501_v46  ;;  %v1681_v59 = vperm.slane %v1414_v50, %v3509_v56 }
 0x1bf   : > { %v866_v26 = vpop.xlane.xlu0 %865  ;;  %v988_v16 = vmul.f32 0.020408163, %v3916_v17 }
 0x1c0   : > { %v1023_v8 = vmul.f32 0.020408163, %v866_v26  ;;  %v1674_v26 = vsel %vm1471_vm7, %v1673_v25, %v1672_v6 }
 0x1c2   : > { %v1097_v14 = vpack.c.bf16 %v1023_v8, %v1022_v44  ;;  %v989_v44 = vmul.f32 0.020408163, %v3914_v11  ;;  %v2734_v11 = vld [vmem:[%s3336_s10 + $0x208] sm:$0xff] }
 0x1c4   : > { %v1429_v51 = vunpack.c.l.b16 %v1097_v14  ;;  %v1430_v30 = vunpack.c.h.b16 %v1097_v14 }
 0x1c6   : > { %v3924_v10 = vpop.xlane.xlu2 %868  ;;  %v824_v38 = vpop.xlane.xlu1 %823 }
 0x1c7   : > { %v821_v43 = vpop.xlane.xlu0 %820  ;;  %v1009_v0 = vmul.f32 0.020408163, %v824_v38  ;;  %v1427_v38 = vunpack.c.l.b16 %v1096_v32  ;;  %v1024_v62 = vmul.f32 0.020408163, %v3924_v10  ;;  %v2709_v32 = vld [vmem:[%s3336_s10 + $0x140] sm:$0xff]  ;;  %v1079_v10 = vpack.c.bf16 %v987_v48, %v986_v41 }
 0x1c8   : > { %v1008_v4 = vmul.f32 0.020408163, %v821_v43  ;;  %v1676_v43 = vsel %vm1475_vm8, %v1675_v45, %v1674_v26  ;;  %2237 = vmatpush.bf16.msrb.mxu1 %v2709_v32  ;;  %v1710_v26 = vperm.slane %v1429_v51, %v3501_v46 }
 0x1c9   : > { %v1706_v47 = vperm.slane %v1427_v38, %v3477_v12  ;;  %v1678_v6 = vsel %vm1479_vm9, %v1677_v20, %v1676_v43  ;;  %v1393_v63 = vunpack.c.l.b16 %v1079_v10 }
 0x1ca   : > { %v1090_v18 = vpack.c.bf16 %v1009_v0, %v1008_v4  ;;  %v1680_v8 = vsel %vm1483_vm10, %v1679_v53, %v1678_v6  ;;  %v1712_v53 = vperm.slane %v1430_v30, %v3509_v56 }
 0x1cb   : > { %v1682_v36 = vsel %vm1487_vm11, %v1681_v59, %v1680_v8 }
 0x1cc   : > { %v1415_v55 = vunpack.c.l.b16 %v1090_v18  ;;  %v1416_v31 = vunpack.c.h.b16 %v1090_v18  ;;  %v1707_v18 = vsel %vm1475_vm8, %v1706_v47, %v1705_v40 }
 0x1cd   : > { %v1709_v17 = vsel %vm1479_vm9, %v1708_v28, %v1707_v18 }
 0x1ce   : > { %v3935_v13 = vpop.xlane.xlu2 %769  ;;  %v3937_v9 = vpop.xlane.xlu1 %766  ;;  %v1683_v39 = vperm.slane %v1415_v55, %v3512_v57  ;;  %v1685_v37 = vperm.slane %v1416_v31, %v3517_v1  ;;  %v1711_v14 = vsel %vm1483_vm10, %v1710_v26, %v1709_v17  ;;  %v2733_v31 = vld [vmem:[%s3336_s10 + $0x200] sm:$0xff] }
 0x1cf   : > { %v2213_v2 = vpop.f32.mrf.mxu3  ;;  %v872_v27 = vpop.xlane.xlu0 %871  ;;  %v991_v54 = vmul.f32 0.020408163, %v3935_v13  ;;  %v1713_v13 = vsel %vm1487_vm11, %v1712_v53, %v1711_v14 }
 0x1d0   : > { %v3943_v29 = vadd.f32 %v2213_v2, %v3885_v34  ;;  %v2089_v34 = vpack.c.b16 %v2021_v35, %v2021_v35  ;;  %v1025_v42 = vmul.f32 0.020408163, %v872_v27  ;;  %v2735_v27 = vld [vmem:[%s3336_s10 + $0x210] sm:$0xff]  ;;  %v1684_v50 = vsel %vm1491_vm12, %v1683_v39, %v1682_v36 }
 0x1d1   : > { %v1686_v51 = vsel %vm1495_vm13, %v1685_v37, %v1684_v50 }
 0x1d2   : > { %v2163_v15 = vsel %vm2161_vm0, %v2089_v34, 0  ;;  %v1098_v45 = vpack.c.bf16 %v1025_v42, %v1024_v62  ;;  %v1080_v34 = vpack.c.bf16 %v989_v44, %v988_v16 }
 0x1d3   : > { %2273 = vmatpush.bf16.msra.mxu0 %v2163_v15  ;;  %v990_v15 = vmul.f32 0.020408163, %v3937_v9 }
 0x1d4   : > { %v1431_v38 = vunpack.c.l.b16 %v1098_v45  ;;  %v1432_v40 = vunpack.c.h.b16 %v1098_v45  ;;  %v1395_v32 = vunpack.c.l.b16 %v1080_v34  ;;  %v1396_v16 = vunpack.c.h.b16 %v1080_v34 }
 0x1d5   : > { %v1081_v39 = vpack.c.bf16 %v991_v54, %v990_v15 }
 0x1d6   : > { %v875_v0 = vpop.xlane.xlu2 %874  ;;  %v830_v4 = vpop.xlane.xlu1 %829  ;;  %v1714_v62 = vperm.slane %v1431_v38, %v3512_v57  ;;  %v1716_v45 = vperm.slane %v1432_v40, %v3517_v1  ;;  %v1644_v37 = vperm.slane %v1395_v32, %v3477_v12 }
 0x1d7   : > { %v1011_v25 = vmul.f32 0.020408163, %v830_v4  ;;  %v2215_v5 = vpop.f32.mrf.mxu3  ;;  %v827_v60 = vpop.xlane.xlu0 %826  ;;  %2274 = vmatpush.bf16.msra.mxu0 %v2735_v27  ;;  %v1026_v4 = vmul.f32 0.020408163, %v875_v0  ;;  %v1397_v38 = vunpack.c.l.b16 %v1081_v39  ;;  %v1398_v17 = vunpack.c.h.b16 %v1081_v39 }
 0x1d8   : > { %v1010_v2 = vmul.f32 0.020408163, %v827_v60  ;;  %v1640_v5 = vperm.slane %v1393_v63, %v3467_v61  ;;  %v1646_v63 = vperm.slane %v1396_v16, %v3485_v22 }
 0x1d9   : > { %v1648_v12 = vperm.slane %v1397_v38, %v3501_v46 }
 0x1da   : > { %v1091_v35 = vpack.c.bf16 %v1011_v25, %v1010_v2  ;;  %v1394_v25 = vunpack.c.h.b16 %v1079_v10  ;;  %v1715_v10 = vsel %vm1491_vm12, %v1714_v62, %v1713_v13  ;;  %v1641_v18 = vsel %vm1467_vm6, %v1640_v5, %v3895_v49 }
 0x1db   : > { %2275 = vmatpush.bf16.msra.mxu0 %v2734_v11  ;;  %v1717_v50 = vsel %vm1495_vm13, %v1716_v45, %v1715_v10 }
 0x1dc   : > { %v1417_v43 = vunpack.c.l.b16 %v1091_v35  ;;  %v1418_v20 = vunpack.c.h.b16 %v1091_v35  ;;  %v1642_v44 = vperm.slane %v1394_v25, %v3471_v3 }
 0x1de   : > { %v1687_v55 = vperm.slane %v1417_v43, %v3528_v19  ;;  %v1689_v42 = vperm.slane %v1418_v20, %v3531_v23  ;;  %v776_v48 = vpop.xlane.xlu2 %775  ;;  %v773_v41 = vpop.xlane.xlu1 %772  ;;  %v1643_v3 = vsel %vm1471_vm7, %v1642_v44, %v1641_v18 }
 0x1df   : > { %v878_v47 = vpop.xlane.xlu0 %877  ;;  %2276 = vmatpush.bf16.msra.mxu0 %v2733_v31  ;;  %v993_v2 = vmul.f32 0.020408163, %v776_v48  ;;  %v992_v0 = vmul.f32 0.020408163, %v773_v41  ;;  %v1650_v41 = vperm.slane %v1398_v17, %v3509_v56 }
 0x1e0   : > { %v1027_v6 = vmul.f32 0.020408163, %v878_v47  ;;  %v1688_v59 = vsel %vm1499_vm14, %v1687_v55, %v1686_v51  ;;  %v1645_v55 = vsel %vm1475_vm8, %v1644_v37, %v1643_v3 }
 0x1e1   : > { %v1690_v60 = vsel %vm1503_vm15, %v1689_v42, %v1688_v59  ;;  %v1082_v43 = vpack.c.bf16 %v993_v2, %v992_v0  ;;  %v1647_v48 = vsel %vm1479_vm9, %v1646_v63, %v1645_v55 }
 0x1e2   : > { %v1099_v9 = vpack.c.bf16 %v1027_v6, %v1026_v4  ;;  %v1741_v8 = vpack.c.b16 %v1690_v60, %v1690_v60  ;;  %v1649_v47 = vsel %vm1483_vm10, %v1648_v12, %v1647_v48 }
 0x1e3   : > { %v1399_v42 = vunpack.c.l.b16 %v1082_v43  ;;  %v1400_v54 = vunpack.c.h.b16 %v1082_v43  ;;  %v1651_v25 = vsel %vm1487_vm11, %v1650_v41, %v1649_v47 }
 0x1e4   : > { %v1433_v27 = vunpack.c.l.b16 %v1099_v9  ;;  %v1434_v28 = vunpack.c.h.b16 %v1099_v9  ;;  %2251 = vmatmul.bf16.vlgmr.msrb.gmra.mxu2 %v1741_v8 }
 0x1e5   : > { %v1652_v51 = vperm.slane %v1399_v42, %v3512_v57  ;;  %v1654_v5 = vperm.slane %v1400_v54, %v3517_v1 }
 0x1e6   : > { %v1718_v30 = vperm.slane %v1433_v27, %v3528_v19  ;;  %v1720_v26 = vperm.slane %v1434_v28, %v3531_v23  ;;  %v779_v35 = vpop.xlane.xlu2 %778  ;;  %v884_v36 = vpop.xlane.xlu1 %883 }
 0x1e7   : > { %v881_v20 = vpop.xlane.xlu0 %880  ;;  %v1029_v34 = vmul.f32 0.020408163, %v884_v36  ;;  %v994_v59 = vmul.f32 0.020408163, %v779_v35  ;;  %v1653_v13 = vsel %vm1491_vm12, %v1652_v51, %v1651_v25 }
 0x1e8   : > { %v1719_v11 = vsel %vm1499_vm14, %v1718_v30, %v1717_v50  ;;  %v1028_v14 = vmul.f32 0.020408163, %v881_v20  ;;  %v1655_v28 = vsel %vm1495_vm13, %v1654_v5, %v1653_v13 }
 0x1e9   : > { %v1721_v49 = vsel %vm1503_vm15, %v1720_v26, %v1719_v11 }
 0x1ea   : > { %v1742_v53 = vpack.c.b16 %v1721_v49, %v1721_v49  ;;  %v1100_v15 = vpack.c.bf16 %v1029_v34, %v1028_v14 }
 0x1ec   : > { %2264 = vmatmul.bf16.vlgmr.msrb.gmra.mxu3 %v1742_v53  ;;  %v1435_v60 = vunpack.c.l.b16 %v1100_v15  ;;  %v1436_v32 = vunpack.c.h.b16 %v1100_v15 }
 0x1ee   : > { %v890_v40 = vpop.xlane.xlu2 %889  ;;  %v887_v22 = vpop.xlane.xlu1 %886  ;;  %v1722_v57 = vperm.slane %v1435_v60, %v3427_v7  ;;  %v1723_v1 = vperm.slane %v1436_v32, %v3435_v21 }
 0x1ef   : > { %v1031_v62 = vmul.f32 0.020408163, %v890_v40  ;;  %v1030_v4 = vmul.f32 0.020408163, %v887_v22  ;;  %v782_v6 = vpop.xlane.xlu0 %781  ;;  %v1035_v40 = vld [vmem:[#allocation2] sm:$0x1] }
 0x1f0   : > { %v995_v31 = vmul.f32 0.020408163, %v782_v6  ;;  %v1724_v37 = vsel %vm1447_vm1, %v1723_v1, %v1722_v57  ;;  %vm2157_vm1 = vcmask 457728  }
 0x1f1   : > { %v1101_v46 = vpack.c.bf16 %v1031_v62, %v1030_v4 }
 0x1f2   : > { %v1083_v56 = vpack.c.bf16 %v995_v31, %v994_v59 }
 0x1f3   : > { %v1437_v9 = vunpack.c.l.b16 %v1101_v46  ;;  %v1438_v10 = vunpack.c.h.b16 %v1101_v46 }
 0x1f4   : > { %v1401_v8 = vunpack.c.l.b16 %v1083_v56  ;;  %v1402_v39 = vunpack.c.h.b16 %v1083_v56 }
 0x1f5   : > { %v1725_v30 = vperm.slane %v1437_v9, %v3438_v24  ;;  %v1727_v38 = vperm.slane %v1438_v10, %v3442_v33 }
 0x1f6   : > { %v1656_v45 = vperm.slane %v1401_v8, %v3528_v19  ;;  %v1658_v2 = vperm.slane %v1402_v39, %v3531_v23  ;;  %v896_v0 = vpop.xlane.xlu1 %895  ;;  %v899_v27 = vpop.xlane.xlu2 %898 }
 0x1f7   : > { %v1033_v44 = vmul.f32 0.020408163, %v896_v0  ;;  %v893_v16 = vpop.xlane.xlu0 %892  ;;  %v1034_v18 = vmul.f32 0.020408163, %v899_v27  ;;  %v1726_v21 = vsel %vm1451_vm2, %v1725_v30, %v1724_v37 }
 0x1f8   : > { %v1032_v26 = vmul.f32 0.020408163, %v893_v16  ;;  %v1657_v35 = vsel %vm1499_vm14, %v1656_v45, %v1655_v28  ;;  %v1728_v63 = vsel %vm1455_vm3, %v1727_v38, %v1726_v21 }
 0x1f9   : > { %v1103_v7 = vpack.c.bf16 %v1034_v18, %v1034_v18  ;;  %v1659_v19 = vsel %vm1503_vm15, %v1658_v2, %v1657_v35 }
 0x1fa   : > { %v1102_v36 = vpack.c.bf16 %v1033_v44, %v1032_v26  ;;  %v1740_v23 = vpack.c.b16 %v1659_v19, %v1659_v19 }
 0x1fb   : > { %v1441_v43 = vunpack.c.l.b16 %v1103_v7 }
 0x1fc   : > { %v1439_v20 = vunpack.c.l.b16 %v1102_v36  ;;  %v1440_v50 = vunpack.c.h.b16 %v1102_v36  ;;  %2238 = vmatmul.bf16.vlgmr.msrb.gmra.mxu1 %v1740_v23 }
 0x1fd   : > { %v1733_v3 = vperm.slane %v1441_v43, %v3467_v61 }
 0x1fe   : > { %v1729_v24 = vperm.slane %v1439_v20, %v3457_v52  ;;  %v1731_v11 = vperm.slane %v1440_v50, %v3463_v58 }
 0x200   : > { %v1730_v49 = vsel %vm1459_vm4, %v1729_v24, %v1728_v63 }
 0x201   : > { %v1732_v17 = vsel %vm1463_vm5, %v1731_v11, %v1730_v49 }
 0x202   : > { %v1734_v33 = vsel %vm1467_vm6, %v1733_v3, %v1732_v17 }
 0x203   : > { %v1743_v34 = vpack.c.b16 %v1734_v33, %v1734_v33 }
 0x205   : > { %2665 = vmatmul.msk.bf16.vlgmr.msra.gmra.mxu0 %vm2157_vm1, %v1743_v34 }
 0x208   : > { %v2226_v14 = vpop.f32.mrf.mxu0 }
 0x209   : > { %v2227_v53 = vadd.f32 %v2226_v14, %v3943_v29 }
 0x210   : > { %v2228_v55 = vpop.f32.mrf.mxu0 }
 0x267   : > { %v2252_v52 = vpop.f32.mrf.mxu2 }
 0x26f   : > { %v2254_v12 = vpop.f32.mrf.mxu2  ;;  %v2265_v58 = vpop.f32.mrf.mxu3 }
 0x277   : > { %v2267_v42 = vpop.f32.mrf.mxu3 }
 0x279   : > { %v2239_v61 = vpop.f32.mrf.mxu1 }
 0x27a   : > { %v2240_v48 = vadd.f32 %v2239_v61, %v2227_v53 }
 0x27c   : > { %v2253_v41 = vadd.f32 %v2252_v52, %v2240_v48 }
 0x27e   : > { %v2266_v15 = vadd.f32 %v2265_v58, %v2253_v41 }
 0x281   : > { %v2241_v54 = vpop.f32.mrf.mxu1 }
 0x282   : > { %v2278_v22 = vpop.f32.mrf.mxu0 }
 0x283   : > { %v2279_v47 = vadd.f32 %v2278_v22, %v2266_v15 }
 0x285   : > { %v2282_v51 = vadd.f32 %v2279_v47, %v1035_v40 }
 0x286   : > { %2287 = sbr.rel (%p2666_p1) target bundleno = 658 (0x292), region = 40 }
 0x287   : > { %2283 = vst [vmem:[#allocation2] sm:$0x1] %v2282_v51 }
 0x28a   : > { %v2280_v62 = vpop.f32.mrf.mxu0 }
 0x28b   : > { %v2289_v4 = vld [vmem:[%s4081_s2] sm:$0x1] }
 0x28e   : > { %v2288_v29 = vld [vmem:[#allocation2] sm:$0x1] }
 0x28f   : > { %v2290_v6 = vadd.f32 %v2289_v4, %v2288_v29 }
 0x291   : > { %2291 = vst [vmem:[%s3345_s27] sm:$0x1] %v2290_v6 }
 0x292 PF: > { %s2301_s7 = scalar_lea.hbm %s4082_s3, %s3225_s16  ;;  %s2303_s8 = sshll.u32 %s3345_s27, 4  ;;  %s2304_s8 = int_to_ptr.vmem [resolvable:$true] %s2303_s8 }
 0x293   : > { %s2305_s15 = sshll.u32 %s2301_s7, 4  ;;  %s2293_s9 = scalar_lea.sflag [#allocation4], %s200_s29  ;;  %s2306_s15 = int_to_ptr.hbm [resolvable:$true] %s2305_s15 }
 0x294   : > { %s3157_s10 = sshra.s32 %s2306_s15, 4  ;;  %s3163_s26 = scalar_lea.hbm %s4082_s3, 2  ;;  %s3158_s10 = int_to_ptr.hbm [resolvable:$true] %s3157_s10 }
 0x295   : > { %s3159_s11 = scalar_lea.hbm %s3158_s10, 1  ;;  %p3164_p6 = scmp.lt.s32.totalorder %s3158_s10, %s4082_s3 }
 0x296   : > { %p3160_p2 = scmp.ne.s32.totalorder %s3158_s10, %s3159_s11  ;;  %p3165_p7 = scmp.lt.s32.totalorder %s3163_s26, %s3159_s11 }
 0x298   : > { %p3161_p4 = pnand %p3160_p2, %p3309_p3  ;;  %p3166_p8 = por %p3165_p7, %p3164_p6 }
 0x29a   : > { %p3162_p5 = pneg %p3161_p4 }
 0x29c   : > { %p3167_p10 = pnand %p3166_p8, %p3162_p5 }
 0x29e   : > { %3170 = shalt.err (!%p3167_p10)
}
 0x29f   : > { %3071 = dma.vmem_to_hbm [thread:$0]  (%p3309_p3), %s2304_s8, 16, %s2306_s15, %s2293_s9  }
 0x2a0 PF: > { %p3077_p11 = scmp.ge.s32.totalorder %s3237_s19, 2  ;;  %s2317_s16 = sand.u32 1, %s3209_s12  }
 0x2a1   : > { %s2318_s29 = scalar_lea.sflag [#allocation4], %s2317_s16 }
 0x2a2   : > { %p3074_p12 = pnand %p3077_p11, %p3319_p9 }
 0x2a4   : > { %p3075_p13 = pneg %p3074_p12 }
 0x2a6   : > { %3204 = dma.done.wait (%p3075_p13), %s2318_s29, 16  }
 0x2a7   : > { %3206 = vsyncadd (%p3075_p13), %s2318_s29, 4294967280  ;;  %s16_s19 = sadd.s32 1, %s3237_s19   ;;  %s4085_s12 = smov %s3213_s13 }
 0x2a8   : > { %p13_p0 = scmp.ge.s32.totalorder %s16_s19, 10   ;;  %s4086_s13 = smov %s3217_s14 }
 0x2a9   : > { %s4087_s14 = smov %s3327_s28  ;;  %s4088_s15 = smov %s3229_s17 }
 0x2aa   : > { %s4089_s16 = smov %s3233_s18  ;;  %s4090_s17 = smov %s4093_s22 }
 0x2ab   : > { %s4091_s18 = smov %s4097_s23  ;;  %15 = sbr.rel (!%p13_p0) target bundleno = 5 (0x5), region = 78 }
 0x2b0   :  { %2323 = vsyncpa [#allocation4], 1 }
 0x2b1   :  { %2325 = vsyncpa [#allocation4 + $0x1], 1 }

</bundles_post_ra>
